<compile_context>
chip_gen: v7x
topology: tpu7x:2x2x1
jax: 0.10.0
libtpu: 0.0.40
codegen_flags: <defaults>
</compile_context>

<pallas_src>
import math
import jax
import jax.numpy as jnp
from jax.experimental import pallas as pl
from jax.experimental.pallas import tpu as pltpu


def _silu(x):
    return x * jax.nn.sigmoid(x)


def _softplus(x):
    # stable softplus using only exp/log/abs/max (all plain VPU/EUP ops)
    return jnp.maximum(x, 0.0) + jnp.log(1.0 + jnp.exp(-jnp.abs(x)))


# -------------------------- Mamba block kernel --------------------------
def _mamba_kernel(h_ref, tem_ref, mask_ref,
                  inx_w_ref, inz_w_ref, conv_w_ref, conv_b_ref,
                  xdt_w_ref, xB_w_ref, xC_w_ref, dtproj_w_ref, dt_bias_ref,
                  A_ref, D_ref, out_w_ref,
                  o_ref,
                  delta_scr, du_scr, Bm_scr, Cm_scr, y_scr, dA_scr):
    Bb, L, dm = h_ref.shape
    d_conv, d_inner = conv_w_ref.shape
    d_state = A_ref.shape[0]
    Lc = dA_scr.shape[0]
    n_chunks = L // Lc
    N = Bb * L

    # ---- input projection (fused `enc + tem`); x / z from split weights ----
    h = (h_ref[...] + tem_ref[...]).reshape(N, dm).astype(jnp.bfloat16)
    x = jnp.dot(h, inx_w_ref[...], preferred_element_type=jnp.float32)   # (N, d_inner)
    z = jnp.dot(h, inz_w_ref[...], preferred_element_type=jnp.float32)   # (N, d_inner)

    # ---- depthwise causal conv1d: shifted in-register MACs (roll + iota mask) ----
    # within-batch time index (resets every L rows) so rolls never leak across
    # batch elements; zero-padding semantics of Conv1d(padding=d_conv-1)[:L].
    pos = jnp.tile(jax.lax.broadcasted_iota(jnp.int32, (L, d_inner), 0), (Bb, 1))
    acc = x * conv_w_ref[d_conv - 1:d_conv, :]
    for k in range(d_conv - 1):                         # d_conv-1 (=3) static taps
        s = d_conv - 1 - k
        if s < L:
            shifted = pltpu.roll(x, shift=s, axis=0)    # XLU sublane rotate
            acc = acc + jnp.where(pos >= s, shifted, 0.0) * conv_w_ref[k:k + 1, :]
    xc = _silu(acc + conv_b_ref[...])                   # (N, d_inner), f32

    # ---- x_proj (split dt / B / C weights -> no lane-misaligned slicing) ----
    xcb = xc.astype(jnp.bfloat16)
    dt_lr = jnp.dot(xcb, xdt_w_ref[...], preferred_element_type=jnp.float32)
    Bmat = jnp.dot(xcb, xB_w_ref[...], preferred_element_type=jnp.float32)   # (N, d_state)
    Cmat = jnp.dot(xcb, xC_w_ref[...], preferred_element_type=jnp.float32)   # (N, d_state)
    dt = jnp.dot(dt_lr.astype(jnp.bfloat16), dtproj_w_ref[...],
                 preferred_element_type=jnp.float32)
    delta = _softplus(dt + dt_bias_ref[...])                                 # (N, d_inner)

    # scan inputs to scratch for dynamic row access inside fori loops
    delta_scr[...] = delta
    du_scr[...] = delta * xc
    Bm_scr[...] = Bmat
    Cm_scr[...] = Cmat

    A = A_ref[...]                                       # (d_state, d_inner), = -exp(A_log)
    eye = (jax.lax.broadcasted_iota(jnp.int32, (d_state, d_state), 0) ==
           jax.lax.broadcasted_iota(jnp.int32, (d_state, d_state), 1)).astype(jnp.float32)

    # ---- selective scan ----
    # state[n, d] = exp(delta*A)[n, d] * state[n, d] + delta*u[d]*B[n]
    # y[l, d]     = sum_n state[n, d] * C[l, n]   (fused into the step; no
    # per-step state writeback).  exp(delta*A) is hoisted into a separate
    # "fill" loop per chunk so the EUP stays off the serial carry chain.
    def batch_body(b, carry):
        def chunk_body(c, st):
            r0 = b * L + c * Lc

            def fill(l, _):
                d_row = delta_scr[pl.ds(r0 + l, 1), :]          # (1, d_inner)
                dA_scr[l] = jnp.exp(A * d_row)                  # (d_state, d_inner)
                return 0
            jax.lax.fori_loop(0, Lc, fill, 0)

            def step(l, st):
                row = r0 + l
                u_row = du_scr[pl.ds(row, 1), :]                # (1, d_inner)
                b_row = Bm_scr[pl.ds(row, 1), :]                # (1, d_state)
                c_row = Cm_scr[pl.ds(row, 1), :]                # (1, d_state)
                # row -> column via identity mask + lane reduce (XLU slot)
                b_col = jnp.sum(b_row * eye, axis=-1, keepdims=True)   # (d_state, 1)
                c_col = jnp.sum(c_row * eye, axis=-1, keepdims=True)   # (d_state, 1)
                st = st * dA_scr[l] + b_col * u_row             # FMA on the carry
                y_scr[pl.ds(row, 1), :] = jnp.sum(st * c_col, axis=0, keepdims=True)
                return st
            return jax.lax.fori_loop(0, Lc, step, st)

        jax.lax.fori_loop(0, n_chunks, chunk_body,
                          jnp.zeros((d_state, d_inner), jnp.float32))
        return carry

    jax.lax.fori_loop(0, Bb, batch_body, 0)

    # ---- skip, gate, out projection, fused non_pad_mask ----
    y = y_scr[...] + D_ref[...] * xc
    y = y * _silu(z)
    out = jnp.dot(y.astype(jnp.bfloat16), out_w_ref[...],
                  preferred_element_type=jnp.float32)           # (N, dm)
    out = out * mask_ref[...].reshape(N, 1)
    o_ref[...] = out.reshape(Bb, L, dm)


def _const_spec(arr):
    nd = arr.ndim
    return pl.BlockSpec(arr.shape, lambda i, nd=nd: (0,) * nd)


def _chunk_len(L, target=64):
    # chunk length bounds the exp(delta*A) scratch; 64 keeps it v7x-friendly
    if L <= target:
        return L
    for c in range(target, 0, -1):
        if L % c == 0:
            return c
    return L


def _pick_block_b(B, L, target_rows=256):
    bb = max(1, min(B, target_rows // max(L, 1)))
    if B >= 2:
        bb = min(bb, B // 2)        # keep >= 2 parallel grid steps (v7x dual-TC)
    bb = max(bb, 1)
    while B % bb:
        bb -= 1
    return bb


def _pick_row_tile(n, target=512):
    for t in range(min(n, target), 0, -1):
        if n % t == 0 and (t % 8 == 0 or t == n):
            return t
    return n


def _vmem_limit(est_bytes):
    return int(min(max(2 * est_bytes, 16 * 2**20), 100 * 2**20))


_MAMBA_W_KEYS = ('inx_w', 'inz_w', 'conv_w', 'conv_b', 'xdt_w', 'xB_w', 'xC_w',
                 'dtproj_w', 'dt_bias', 'A', 'D', 'out_w')


def mamba_forward(p, enc, tem, mask):
    B, L, D = enc.shape
    d_conv, d_inner = p['conv_w'].shape
    d_state = p['A'].shape[0]
    dt_rank = p['dtproj_w'].shape[0]
    Bb = _pick_block_b(B, L)
    Lc = _chunk_len(L)
    Nb = Bb * L

    batch_map = lambda i: (i, 0, 0)
    data_spec = pl.BlockSpec((Bb, L, D), batch_map)
    mask_spec = pl.BlockSpec((Bb, L, 1), batch_map)
    weights = [p[k] for k in _MAMBA_W_KEYS]
    wbytes = sum(int(w.size) * w.dtype.itemsize for w in weights)

    # rough flops / bytes (advisory only)
    flops = 2 * B * L * (D * 2 * d_inner + d_inner * (dt_rank + 2 * d_state)
                         + dt_rank * d_inner + d_inner * D)
    flops += B * L * d_inner * (2 * d_conv + 8 * d_state + 12)
    trans = B * L * d_inner * (d_state + 4)
    nbytes = 4 * (3 * B * L * D + B * L) + wbytes

    scratch_bytes = 4 * (3 * Nb * d_inner + 2 * Nb * d_state + Lc * d_state * d_inner)
    est = 2 * 4 * (3 * Nb * D + Nb) + 2 * wbytes + scratch_bytes + 8 * Nb * d_inner * 4

    return pl.pallas_call(
        _mamba_kernel,
        out_shape=jax.ShapeDtypeStruct((B, L, D), jnp.float32),
        grid_spec=pltpu.PrefetchScalarGridSpec(
            num_scalar_prefetch=0, grid=(B // Bb,),
            in_specs=[data_spec, data_spec, mask_spec]
                     + [_const_spec(w) for w in weights],
            out_specs=data_spec,
            scratch_shapes=[
                pltpu.VMEM((Nb, d_inner), jnp.float32),            # delta
                pltpu.VMEM((Nb, d_inner), jnp.float32),            # delta * u
                pltpu.VMEM((Nb, d_state), jnp.float32),            # B
                pltpu.VMEM((Nb, d_state), jnp.float32),            # C
                pltpu.VMEM((Nb, d_inner), jnp.float32),            # y (scan output)
                pltpu.VMEM((Lc, d_state, d_inner), jnp.float32),   # exp(delta*A) chunk
            ]),
        compiler_params=pltpu.CompilerParams(
            dimension_semantics=("parallel",),
            vmem_limit_bytes=_vmem_limit(est)),
        cost_estimate=pl.CostEstimate(flops=int(flops),
                                      transcendentals=int(trans),
                                      bytes_accessed=int(nbytes)),
    )(enc, tem, mask, *weights)


# ----------------- PositionwiseFeedForward (post-norm) kernel -----------------
def _ffn_kernel(x_ref, mask_ref, w1_ref, b1_ref, w2_ref, b2_ref, g_ref,
                beta_ref, o_ref):
    x = x_ref[...]                                    # (tile, D), f32
    h = jnp.dot(x.astype(jnp.bfloat16), w1_ref[...],
                preferred_element_type=jnp.float32) + b1_ref[...]
    # exact (erf-based) GELU, matching F.gelu default
    h = 0.5 * h * (1.0 + jax.lax.erf(h * 0.7071067811865476))
    y = jnp.dot(h.astype(jnp.bfloat16), w2_ref[...],
                preferred_element_type=jnp.float32) + b2_ref[...]
    y = y + x                                         # residual
    mean = jnp.mean(y, axis=-1, keepdims=True)        # LayerNorm (post-norm), eps=1e-6
    var = jnp.mean(jnp.square(y - mean), axis=-1, keepdims=True)
    y = (y - mean) * jax.lax.rsqrt(var + 1e-6)
    o_ref[...] = (y * g_ref[...] + beta_ref[...]) * mask_ref[...]  # fused non_pad_mask


def ffn_forward(p, x, mask):
    B, L, D = x.shape
    N = B * L
    H = p['w1'].shape[1]
    x2 = x.reshape(N, D)
    m2 = mask.reshape(N, 1)
    tile = _pick_row_tile(N)
    weights = [p[k] for k in ('w1', 'b1', 'w2', 'b2', 'ln_g', 'ln_b')]
    wbytes = sum(int(w.size) * w.dtype.itemsize for w in weights)

    flops = 4 * N * D * H + 14 * N * D
    nbytes = 4 * (2 * N * D + N) + wbytes
    est = 2 * 4 * (2 * tile * D + tile) + 2 * wbytes + 4 * 4 * tile * H

    out = pl.pallas_call(
        _ffn_kernel,
        out_shape=jax.ShapeDtypeStruct((N, D), jnp.float32),
        grid_spec=pltpu.PrefetchScalarGridSpec(
            num_scalar_prefetch=0, grid=(N // tile,),
            in_specs=[pl.BlockSpec((tile, D), lambda i: (i, 0)),
                      pl.BlockSpec((tile, 1), lambda i: (i, 0))]
                     + [_const_spec(w) for w in weights],
            out_specs=pl.BlockSpec((tile, D), lambda i: (i, 0))),
        compiler_params=pltpu.CompilerParams(
            dimension_semantics=("parallel",),
            vmem_limit_bytes=_vmem_limit(est)),
        cost_estimate=pl.CostEstimate(flops=int(flops),
                                      transcendentals=int(N * H),
                                      bytes_accessed=int(nbytes)),
    )(x2, m2, *weights)
    return out.reshape(B, L, D)


# ------------------------------ glue (plain JAX) ------------------------------
def temporal_enc(time, non_pad_mask, position_vec):
    d_model = position_vec.shape[0]
    phase = time[:, :, None] / position_vec
    even = (jnp.arange(d_model) % 2) == 0
    pe = jnp.where(even, jnp.sin(phase), jnp.cos(phase))
    return pe * non_pad_mask


def encoder_forward(params, event_type, event_time, non_pad_mask):
    # NOTE: the reference builds slf_attn_mask but the Mamba-based EncoderLayer
    # never consumes it, so it is not constructed here (saves a (B,L,L) pass).
    tem = temporal_enc(event_time, non_pad_mask, params['position_vec'])
    enc = params['emb'][event_type]                   # embedding lookup
    for layer in params['layers']:
        # EncoderLayer: Mamba -> *non_pad_mask -> FFN -> *non_pad_mask
        # (`enc + tem` and both mask multiplies are fused inside the kernels)
        enc = mamba_forward(layer['mamba'], enc, tem, non_pad_mask)
        enc = ffn_forward(layer['ffn'], enc, non_pad_mask)  # TODO(synk): dropout = identity (inference mode)
    return enc


# ---------------------------- parameter construction ----------------------------
def init_params(key, num_types, d_model, d_ffn, n_layers,
                d_state=16, d_conv=4, expand=2,
                dt_min=0.001, dt_max=0.1, dt_init_floor=1e-4):
    d_inner = expand * d_model
    dt_rank = math.ceil(d_model / 16)
    keys = jax.random.split(key, 1 + n_layers)
    emb = jax.random.normal(keys[0], (num_types + 1, d_model), jnp.float32)
    emb = emb.at[0].set(0.0)                          # padding_idx = 0

    def uni(k, shape, bound):
        return jax.random.uniform(k, shape, jnp.float32, -bound, bound)

    layers = []
    for li in range(n_layers):
        ks = jax.random.split(keys[1 + li], 11)
        # Projection weights stored pre-transposed (in, out) and split per
        # output so kernels run plain lane-aligned `x @ w`; matmul weights are
        # bf16 (MXU native); A = -exp(A_log) precomputed on the host.
        in_w = uni(ks[0], (2 * d_inner, d_model), 1.0 / math.sqrt(d_model))
        x_w = uni(ks[3], (dt_rank + 2 * d_state, d_inner), 1.0 / math.sqrt(d_inner))
        dt = jnp.exp(jax.random.uniform(ks[6], (d_inner,), jnp.float32)
                     * (math.log(dt_max) - math.log(dt_min)) + math.log(dt_min))
        dt = jnp.maximum(dt, dt_init_floor)
        mamba = dict(
            inx_w=in_w[:d_inner].T.astype(jnp.bfloat16),
            inz_w=in_w[d_inner:].T.astype(jnp.bfloat16),
            conv_w=uni(ks[1], (d_conv, d_inner), 1.0 / math.sqrt(d_conv)),
            conv_b=uni(ks[2], (1, d_inner), 1.0 / math.sqrt(d_conv)),
            xdt_w=x_w[:dt_rank].T.astype(jnp.bfloat16),
            xB_w=x_w[dt_rank:dt_rank + d_state].T.astype(jnp.bfloat16),
            xC_w=x_w[dt_rank + d_state:].T.astype(jnp.bfloat16),
            dtproj_w=uni(ks[4], (d_inner, dt_rank), dt_rank ** -0.5).T.astype(jnp.bfloat16),
            dt_bias=(dt + jnp.log(-jnp.expm1(-dt)))[None, :],
            A=-jnp.tile(jnp.arange(1, d_state + 1, dtype=jnp.float32)[:, None],
                        (1, d_inner)),
            D=jnp.ones((1, d_inner), jnp.float32),
            out_w=uni(ks[5], (d_model, d_inner), 1.0 / math.sqrt(d_inner)).T.astype(jnp.bfloat16),
        )
        ffn = dict(
            w1=uni(ks[7], (d_ffn, d_model), 1.0 / math.sqrt(d_model)).T.astype(jnp.bfloat16),
            b1=uni(ks[8], (1, d_ffn), 1.0 / math.sqrt(d_model)),
            w2=uni(ks[9], (d_model, d_ffn), 1.0 / math.sqrt(d_ffn)).T.astype(jnp.bfloat16),
            b2=uni(ks[10], (1, d_model), 1.0 / math.sqrt(d_ffn)),
            ln_g=jnp.ones((1, d_model), jnp.float32),
            ln_b=jnp.zeros((1, d_model), jnp.float32),
        )
        layers.append(dict(mamba=mamba, ffn=ffn))

    position_vec = jnp.array(
        [math.pow(10000.0, 2.0 * (i // 2) / d_model) for i in range(d_model)],
        jnp.float32)
    return dict(emb=emb, layers=layers, position_vec=position_vec)


if __name__ == "__main__":
    num_types, d_model, d_ffn, n_layers = 5, 32, 64, 2
    B, L = 2, 8
    key = jax.random.PRNGKey(0)
    kp, kt, ktime = jax.random.split(key, 3)

    params = init_params(kp, num_types, d_model, d_ffn, n_layers)
    event_type = jax.random.randint(kt, (B, L), 1, num_types + 1)
    event_type = event_type.at[0, -2:].set(0)         # padded tail
    event_time = jax.random.uniform(ktime, (B, L), jnp.float32, 0.0, 10.0)
    event_time = event_time * (event_type != 0)
    non_pad_mask = (event_type != 0).astype(jnp.float32)[..., None]

    fwd = jax.jit(encoder_forward)
    out = fwd(params, event_type, event_time, non_pad_mask)
    out = jax.block_until_ready(out)
    assert out.shape == (B, L, d_model)
    assert bool(jnp.all(jnp.isfinite(out)))
    print("KERNEL_OK")
</pallas_src>

<mosaic_0001>
module attributes {stable_mosaic.version = 11 : i64} {
  func.func @_ffn_kernel(%arg0: i32, %arg1: memref<16x32xf32, #tpu.memory_space<vmem>>, %arg2: memref<16x1xf32, #tpu.memory_space<vmem>>, %arg3: memref<32x64xbf16, #tpu.memory_space<vmem>>, %arg4: memref<1x64xf32, #tpu.memory_space<vmem>>, %arg5: memref<64x32xbf16, #tpu.memory_space<vmem>>, %arg6: memref<1x32xf32, #tpu.memory_space<vmem>>, %arg7: memref<1x32xf32, #tpu.memory_space<vmem>>, %arg8: memref<1x32xf32, #tpu.memory_space<vmem>>, %arg9: memref<16x32xf32, #tpu.memory_space<vmem>>) attributes {dimension_semantics = [#tpu.dimension_semantics<parallel>], iteration_bounds = array<i64: 1>, scalar_prefetch = 0 : i64, scratch_operands = 0 : i64, tpu.core_type = #tpu.core_type<tc>, window_params = [{transform_indices = @transform_0, window_bounds = array<i64: 16, 32>}, {transform_indices = @transform_1, window_bounds = array<i64: 16, 1>}, {pipeline_mode = #tpu.pipeline_mode<synchronous>, transform_indices = @transform_2, window_bounds = array<i64: 32, 64>}, {pipeline_mode = #tpu.pipeline_mode<synchronous>, transform_indices = @transform_3, window_bounds = array<i64: 1, 64>}, {pipeline_mode = #tpu.pipeline_mode<synchronous>, transform_indices = @transform_4, window_bounds = array<i64: 64, 32>}, {pipeline_mode = #tpu.pipeline_mode<synchronous>, transform_indices = @transform_5, window_bounds = array<i64: 1, 32>}, {pipeline_mode = #tpu.pipeline_mode<synchronous>, transform_indices = @transform_6, window_bounds = array<i64: 1, 32>}, {pipeline_mode = #tpu.pipeline_mode<synchronous>, transform_indices = @transform_7, window_bounds = array<i64: 1, 32>}, {transform_indices = @transform_8, window_bounds = array<i64: 16, 32>}]} {
    %c0 = arith.constant 0 : index
    %c0_0 = arith.constant 0 : index
    %0 = vector.load %arg1[%c0, %c0_0] : memref<16x32xf32, #tpu.memory_space<vmem>>, vector<16x32xf32>
    %1 = arith.truncf %0 : vector<16x32xf32> to vector<16x32xbf16>
    %c0_1 = arith.constant 0 : index
    %c0_2 = arith.constant 0 : index
    %2 = vector.load %arg3[%c0_1, %c0_2] : memref<32x64xbf16, #tpu.memory_space<vmem>>, vector<32x64xbf16>
    %cst = arith.constant dense<0.000000e+00> : vector<16x64xf32>
    %3 = tpu.matmul %1, %2, %cst {dimension_numbers = #tpu.dot_dimension_numbers<[1], [0], [0], [1], [0, 0, 1, 1], [], []>} : vector<16x32xbf16>, vector<32x64xbf16>, vector<16x64xf32> -> vector<16x64xf32>
    %c0_3 = arith.constant 0 : index
    %c0_4 = arith.constant 0 : index
    %4 = vector.load %arg4[%c0_3, %c0_4] : memref<1x64xf32, #tpu.memory_space<vmem>>, vector<1x64xf32>
    %5 = vector.broadcast %4 : vector<1x64xf32> to vector<16x64xf32>
    %6 = arith.addf %3, %5 : vector<16x64xf32>
    %cst_5 = arith.constant 5.000000e-01 : f32
    %7 = vector.broadcast %cst_5 : f32 to vector<16x64xf32>
    %8 = arith.mulf %7, %6 : vector<16x64xf32>
    %cst_6 = arith.constant 0.707106769 : f32
    %9 = vector.broadcast %cst_6 : f32 to vector<16x64xf32>
    %10 = arith.mulf %6, %9 : vector<16x64xf32>
    %11 = math.erf %10 : vector<16x64xf32>
    %cst_7 = arith.constant 1.000000e+00 : f32
    %12 = vector.broadcast %cst_7 : f32 to vector<16x64xf32>
    %13 = arith.addf %12, %11 : vector<16x64xf32>
    %14 = arith.mulf %8, %13 : vector<16x64xf32>
    %15 = arith.truncf %14 : vector<16x64xf32> to vector<16x64xbf16>
    %c0_8 = arith.constant 0 : index
    %c0_9 = arith.constant 0 : index
    %16 = vector.load %arg5[%c0_8, %c0_9] : memref<64x32xbf16, #tpu.memory_space<vmem>>, vector<64x32xbf16>
    %cst_10 = arith.constant dense<0.000000e+00> : vector<16x32xf32>
    %17 = tpu.matmul %15, %16, %cst_10 {dimension_numbers = #tpu.dot_dimension_numbers<[1], [0], [0], [1], [0, 0, 1, 1], [], []>} : vector<16x64xbf16>, vector<64x32xbf16>, vector<16x32xf32> -> vector<16x32xf32>
    %c0_11 = arith.constant 0 : index
    %c0_12 = arith.constant 0 : index
    %18 = vector.load %arg6[%c0_11, %c0_12] : memref<1x32xf32, #tpu.memory_space<vmem>>, vector<1x32xf32>
    %19 = vector.broadcast %18 : vector<1x32xf32> to vector<16x32xf32>
    %20 = arith.addf %17, %19 : vector<16x32xf32>
    %21 = arith.addf %20, %0 : vector<16x32xf32>
    %cst_13 = arith.constant dense<0.000000e+00> : vector<16xf32>
    %22 = vector.multi_reduction <add>, %21, %cst_13 [1] : vector<16x32xf32> to vector<16xf32>
    %23 = vector.shape_cast %22 : vector<16xf32> to vector<16x1xf32>
    %cst_14 = arith.constant 3.200000e+01 : f32
    %24 = vector.broadcast %cst_14 : f32 to vector<16x1xf32>
    %25 = arith.divf %23, %24 : vector<16x1xf32>
    %26 = vector.broadcast %25 : vector<16x1xf32> to vector<16x32xf32>
    %27 = arith.subf %21, %26 : vector<16x32xf32>
    %28 = arith.mulf %27, %27 : vector<16x32xf32>
    %cst_15 = arith.constant dense<0.000000e+00> : vector<16xf32>
    %29 = vector.multi_reduction <add>, %28, %cst_15 [1] : vector<16x32xf32> to vector<16xf32>
    %30 = vector.shape_cast %29 : vector<16xf32> to vector<16x1xf32>
    %cst_16 = arith.constant 3.200000e+01 : f32
    %31 = vector.broadcast %cst_16 : f32 to vector<16x1xf32>
    %32 = arith.divf %30, %31 : vector<16x1xf32>
    %33 = vector.broadcast %25 : vector<16x1xf32> to vector<16x32xf32>
    %34 = arith.subf %21, %33 : vector<16x32xf32>
    %cst_17 = arith.constant 9.99999997E-7 : f32
    %35 = vector.broadcast %cst_17 : f32 to vector<16x1xf32>
    %36 = arith.addf %32, %35 : vector<16x1xf32>
    %37 = math.rsqrt %36 : vector<16x1xf32>
    %38 = vector.broadcast %37 : vector<16x1xf32> to vector<16x32xf32>
    %39 = arith.mulf %34, %38 : vector<16x32xf32>
    %c0_18 = arith.constant 0 : index
    %c0_19 = arith.constant 0 : index
    %40 = vector.load %arg7[%c0_18, %c0_19] : memref<1x32xf32, #tpu.memory_space<vmem>>, vector<1x32xf32>
    %41 = vector.broadcast %40 : vector<1x32xf32> to vector<16x32xf32>
    %42 = arith.mulf %39, %41 : vector<16x32xf32>
    %c0_20 = arith.constant 0 : index
    %c0_21 = arith.constant 0 : index
    %43 = vector.load %arg8[%c0_20, %c0_21] : memref<1x32xf32, #tpu.memory_space<vmem>>, vector<1x32xf32>
    %44 = vector.broadcast %43 : vector<1x32xf32> to vector<16x32xf32>
    %45 = arith.addf %42, %44 : vector<16x32xf32>
    %c0_22 = arith.constant 0 : index
    %c0_23 = arith.constant 0 : index
    %46 = vector.load %arg2[%c0_22, %c0_23] : memref<16x1xf32, #tpu.memory_space<vmem>>, vector<16x1xf32>
    %47 = vector.broadcast %46 : vector<16x1xf32> to vector<16x32xf32>
    %48 = arith.mulf %45, %47 : vector<16x32xf32>
    %c0_24 = arith.constant 0 : index
    %c0_25 = arith.constant 0 : index
    %49 = vector.load %arg9[%c0_24, %c0_25] : memref<16x32xf32, #tpu.memory_space<vmem>>, vector<16x32xf32>
    tpu.vector_store %arg9[%c0_24, %c0_25], %48 {strides = array<i32>} : memref<16x32xf32, #tpu.memory_space<vmem>>, vector<16x32xf32>,
    return
  }
  func.func @transform_0(%arg0: i32) -> (i32, i32) {
    %c0_i32 = arith.constant 0 : i32
    %c0_i32_0 = arith.constant 0 : i32
    return %arg0, %c0_i32 : i32, i32
  }
  func.func @transform_1(%arg0: i32) -> (i32, i32) {
    %c0_i32 = arith.constant 0 : i32
    %c0_i32_0 = arith.constant 0 : i32
    return %arg0, %c0_i32 : i32, i32
  }
  func.func @transform_2(%arg0: i32) -> (i32, i32) {
    %c0_i32 = arith.constant 0 : i32
    %c0_i32_0 = arith.constant 0 : i32
    %c0_i32_1 = arith.constant 0 : i32
    return %c0_i32, %c0_i32_0 : i32, i32
  }
  func.func @transform_3(%arg0: i32) -> (i32, i32) {
    %c0_i32 = arith.constant 0 : i32
    %c0_i32_0 = arith.constant 0 : i32
    %c0_i32_1 = arith.constant 0 : i32
    return %c0_i32, %c0_i32_0 : i32, i32
  }
  func.func @transform_4(%arg0: i32) -> (i32, i32) {
    %c0_i32 = arith.constant 0 : i32
    %c0_i32_0 = arith.constant 0 : i32
    %c0_i32_1 = arith.constant 0 : i32
    return %c0_i32, %c0_i32_0 : i32, i32
  }
  func.func @transform_5(%arg0: i32) -> (i32, i32) {
    %c0_i32 = arith.constant 0 : i32
    %c0_i32_0 = arith.constant 0 : i32
    %c0_i32_1 = arith.constant 0 : i32
    return %c0_i32, %c0_i32_0 : i32, i32
  }
  func.func @transform_6(%arg0: i32) -> (i32, i32) {
    %c0_i32 = arith.constant 0 : i32
    %c0_i32_0 = arith.constant 0 : i32
    %c0_i32_1 = arith.constant 0 : i32
    return %c0_i32, %c0_i32_0 : i32, i32
  }
  func.func @transform_7(%arg0: i32) -> (i32, i32) {
    %c0_i32 = arith.constant 0 : i32
    %c0_i32_0 = arith.constant 0 : i32
    %c0_i32_1 = arith.constant 0 : i32
    return %c0_i32, %c0_i32_0 : i32, i32
  }
  func.func @transform_8(%arg0: i32) -> (i32, i32) {
    %c0_i32 = arith.constant 0 : i32
    %c0_i32_0 = arith.constant 0 : i32
    return %arg0, %c0_i32 : i32, i32
  }
}

module attributes {stable_mosaic.version = 11 : i64} {
  func.func @_ffn_kernel(%arg0: i32, %arg1: memref<16x32xf32, #tpu.memory_space<vmem>>, %arg2: memref<16x1xf32, #tpu.memory_space<vmem>>, %arg3: memref<32x64xbf16, #tpu.memory_space<vmem>>, %arg4: memref<1x64xf32, #tpu.memory_space<vmem>>, %arg5: memref<64x32xbf16, #tpu.memory_space<vmem>>, %arg6: memref<1x32xf32, #tpu.memory_space<vmem>>, %arg7: memref<1x32xf32, #tpu.memory_space<vmem>>, %arg8: memref<1x32xf32, #tpu.memory_space<vmem>>, %arg9: memref<16x32xf32, #tpu.memory_space<vmem>>) attributes {dimension_semantics = [#tpu.dimension_semantics<parallel>], iteration_bounds = array<i64: 1>, scalar_prefetch = 0 : i64, scratch_operands = 0 : i64, tpu.core_type = #tpu.core_type<tc>, window_params = [{transform_indices = @transform_0, window_bounds = array<i64: 16, 32>}, {transform_indices = @transform_1, window_bounds = array<i64: 16, 1>}, {pipeline_mode = #tpu.pipeline_mode<synchronous>, transform_indices = @transform_2, window_bounds = array<i64: 32, 64>}, {pipeline_mode = #tpu.pipeline_mode<synchronous>, transform_indices = @transform_3, window_bounds = array<i64: 1, 64>}, {pipeline_mode = #tpu.pipeline_mode<synchronous>, transform_indices = @transform_4, window_bounds = array<i64: 64, 32>}, {pipeline_mode = #tpu.pipeline_mode<synchronous>, transform_indices = @transform_5, window_bounds = array<i64: 1, 32>}, {pipeline_mode = #tpu.pipeline_mode<synchronous>, transform_indices = @transform_6, window_bounds = array<i64: 1, 32>}, {pipeline_mode = #tpu.pipeline_mode<synchronous>, transform_indices = @transform_7, window_bounds = array<i64: 1, 32>}, {transform_indices = @transform_8, window_bounds = array<i64: 16, 32>}]} {
    %c0 = arith.constant 0 : index
    %c0_0 = arith.constant 0 : index
    %0 = vector.load %arg1[%c0, %c0_0] : memref<16x32xf32, #tpu.memory_space<vmem>>, vector<16x32xf32>
    %1 = arith.truncf %0 : vector<16x32xf32> to vector<16x32xbf16>
    %c0_1 = arith.constant 0 : index
    %c0_2 = arith.constant 0 : index
    %2 = vector.load %arg3[%c0_1, %c0_2] : memref<32x64xbf16, #tpu.memory_space<vmem>>, vector<32x64xbf16>
    %cst = arith.constant dense<0.000000e+00> : vector<16x64xf32>
    %3 = tpu.matmul %1, %2, %cst {dimension_numbers = #tpu.dot_dimension_numbers<[1], [0], [0], [1], [0, 0, 1, 1], [], []>} : vector<16x32xbf16>, vector<32x64xbf16>, vector<16x64xf32> -> vector<16x64xf32>
    %c0_3 = arith.constant 0 : index
    %c0_4 = arith.constant 0 : index
    %4 = vector.load %arg4[%c0_3, %c0_4] : memref<1x64xf32, #tpu.memory_space<vmem>>, vector<1x64xf32>
    %5 = vector.broadcast %4 : vector<1x64xf32> to vector<16x64xf32>
    %6 = arith.addf %3, %5 : vector<16x64xf32>
    %cst_5 = arith.constant 5.000000e-01 : f32
    %7 = vector.broadcast %cst_5 : f32 to vector<16x64xf32>
    %8 = arith.mulf %7, %6 : vector<16x64xf32>
    %cst_6 = arith.constant 0.707106769 : f32
    %9 = vector.broadcast %cst_6 : f32 to vector<16x64xf32>
    %10 = arith.mulf %6, %9 : vector<16x64xf32>
    %11 = math.erf %10 : vector<16x64xf32>
    %cst_7 = arith.constant 1.000000e+00 : f32
    %12 = vector.broadcast %cst_7 : f32 to vector<16x64xf32>
    %13 = arith.addf %12, %11 : vector<16x64xf32>
    %14 = arith.mulf %8, %13 : vector<16x64xf32>
    %15 = arith.truncf %14 : vector<16x64xf32> to vector<16x64xbf16>
    %c0_8 = arith.constant 0 : index
    %c0_9 = arith.constant 0 : index
    %16 = vector.load %arg5[%c0_8, %c0_9] : memref<64x32xbf16, #tpu.memory_space<vmem>>, vector<64x32xbf16>
    %cst_10 = arith.constant dense<0.000000e+00> : vector<16x32xf32>
    %17 = tpu.matmul %15, %16, %cst_10 {dimension_numbers = #tpu.dot_dimension_numbers<[1], [0], [0], [1], [0, 0, 1, 1], [], []>} : vector<16x64xbf16>, vector<64x32xbf16>, vector<16x32xf32> -> vector<16x32xf32>
    %c0_11 = arith.constant 0 : index
    %c0_12 = arith.constant 0 : index
    %18 = vector.load %arg6[%c0_11, %c0_12] : memref<1x32xf32, #tpu.memory_space<vmem>>, vector<1x32xf32>
    %19 = vector.broadcast %18 : vector<1x32xf32> to vector<16x32xf32>
    %20 = arith.addf %17, %19 : vector<16x32xf32>
    %21 = arith.addf %20, %0 : vector<16x32xf32>
    %cst_13 = arith.constant dense<0.000000e+00> : vector<16xf32>
    %22 = vector.multi_reduction <add>, %21, %cst_13 [1] : vector<16x32xf32> to vector<16xf32>
    %23 = vector.shape_cast %22 : vector<16xf32> to vector<16x1xf32>
    %cst_14 = arith.constant 3.200000e+01 : f32
    %24 = vector.broadcast %cst_14 : f32 to vector<16x1xf32>
    %25 = arith.divf %23, %24 : vector<16x1xf32>
    %26 = vector.broadcast %25 : vector<16x1xf32> to vector<16x32xf32>
    %27 = arith.subf %21, %26 : vector<16x32xf32>
    %28 = arith.mulf %27, %27 : vector<16x32xf32>
    %cst_15 = arith.constant dense<0.000000e+00> : vector<16xf32>
    %29 = vector.multi_reduction <add>, %28, %cst_15 [1] : vector<16x32xf32> to vector<16xf32>
    %30 = vector.shape_cast %29 : vector<16xf32> to vector<16x1xf32>
    %cst_16 = arith.constant 3.200000e+01 : f32
    %31 = vector.broadcast %cst_16 : f32 to vector<16x1xf32>
    %32 = arith.divf %30, %31 : vector<16x1xf32>
    %33 = vector.broadcast %25 : vector<16x1xf32> to vector<16x32xf32>
    %34 = arith.subf %21, %33 : vector<16x32xf32>
    %cst_17 = arith.constant 9.99999997E-7 : f32
    %35 = vector.broadcast %cst_17 : f32 to vector<16x1xf32>
    %36 = arith.addf %32, %35 : vector<16x1xf32>
    %37 = math.rsqrt %36 : vector<16x1xf32>
    %38 = vector.broadcast %37 : vector<16x1xf32> to vector<16x32xf32>
    %39 = arith.mulf %34, %38 : vector<16x32xf32>
    %c0_18 = arith.constant 0 : index
    %c0_19 = arith.constant 0 : index
    %40 = vector.load %arg7[%c0_18, %c0_19] : memref<1x32xf32, #tpu.memory_space<vmem>>, vector<1x32xf32>
    %41 = vector.broadcast %40 : vector<1x32xf32> to vector<16x32xf32>
    %42 = arith.mulf %39, %41 : vector<16x32xf32>
    %c0_20 = arith.constant 0 : index
    %c0_21 = arith.constant 0 : index
    %43 = vector.load %arg8[%c0_20, %c0_21] : memref<1x32xf32, #tpu.memory_space<vmem>>, vector<1x32xf32>
    %44 = vector.broadcast %43 : vector<1x32xf32> to vector<16x32xf32>
    %45 = arith.addf %42, %44 : vector<16x32xf32>
    %c0_22 = arith.constant 0 : index
    %c0_23 = arith.constant 0 : index
    %46 = vector.load %arg2[%c0_22, %c0_23] : memref<16x1xf32, #tpu.memory_space<vmem>>, vector<16x1xf32>
    %47 = vector.broadcast %46 : vector<16x1xf32> to vector<16x32xf32>
    %48 = arith.mulf %45, %47 : vector<16x32xf32>
    %c0_24 = arith.constant 0 : index
    %c0_25 = arith.constant 0 : index
    %49 = vector.load %arg9[%c0_24, %c0_25] : memref<16x32xf32, #tpu.memory_space<vmem>>, vector<16x32xf32>
    tpu.vector_store %arg9[%c0_24, %c0_25], %48 {strides = array<i32>} : memref<16x32xf32, #tpu.memory_space<vmem>>, vector<16x32xf32>,
    return
  }
  func.func @transform_0(%arg0: i32) -> (i32, i32) {
    %c0_i32 = arith.constant 0 : i32
    %c0_i32_0 = arith.constant 0 : i32
    return %arg0, %c0_i32 : i32, i32
  }
  func.func @transform_1(%arg0: i32) -> (i32, i32) {
    %c0_i32 = arith.constant 0 : i32
    %c0_i32_0 = arith.constant 0 : i32
    return %arg0, %c0_i32 : i32, i32
  }
  func.func @transform_2(%arg0: i32) -> (i32, i32) {
    %c0_i32 = arith.constant 0 : i32
    %c0_i32_0 = arith.constant 0 : i32
    %c0_i32_1 = arith.constant 0 : i32
    return %c0_i32, %c0_i32_0 : i32, i32
  }
  func.func @transform_3(%arg0: i32) -> (i32, i32) {
    %c0_i32 = arith.constant 0 : i32
    %c0_i32_0 = arith.constant 0 : i32
    %c0_i32_1 = arith.constant 0 : i32
    return %c0_i32, %c0_i32_0 : i32, i32
  }
  func.func @transform_4(%arg0: i32) -> (i32, i32) {
    %c0_i32 = arith.constant 0 : i32
    %c0_i32_0 = arith.constant 0 : i32
    %c0_i32_1 = arith.constant 0 : i32
    return %c0_i32, %c0_i32_0 : i32, i32
  }
  func.func @transform_5(%arg0: i32) -> (i32, i32) {
    %c0_i32 = arith.constant 0 : i32
    %c0_i32_0 = arith.constant 0 : i32
    %c0_i32_1 = arith.constant 0 : i32
    return %c0_i32, %c0_i32_0 : i32, i32
  }
  func.func @transform_6(%arg0: i32) -> (i32, i32) {
    %c0_i32 = arith.constant 0 : i32
    %c0_i32_0 = arith.constant 0 : i32
    %c0_i32_1 = arith.constant 0 : i32
    return %c0_i32, %c0_i32_0 : i32, i32
  }
  func.func @transform_7(%arg0: i32) -> (i32, i32) {
    %c0_i32 = arith.constant 0 : i32
    %c0_i32_0 = arith.constant 0 : i32
    %c0_i32_1 = arith.constant 0 : i32
    return %c0_i32, %c0_i32_0 : i32, i32
  }
  func.func @transform_8(%arg0: i32) -> (i32, i32) {
    %c0_i32 = arith.constant 0 : i32
    %c0_i32_0 = arith.constant 0 : i32
    return %arg0, %c0_i32 : i32, i32
  }
}

module attributes {stable_mosaic.version = 11 : i64} {
  func.func @_mamba_kernel(%arg0: i32, %arg1: memref<1x8x32xf32, #tpu.memory_space<vmem>>, %arg2: memref<1x8x32xf32, #tpu.memory_space<vmem>>, %arg3: memref<1x8x1xf32, #tpu.memory_space<vmem>>, %arg4: memref<32x64xbf16, #tpu.memory_space<vmem>>, %arg5: memref<32x64xbf16, #tpu.memory_space<vmem>>, %arg6: memref<4x64xf32, #tpu.memory_space<vmem>>, %arg7: memref<1x64xf32, #tpu.memory_space<vmem>>, %arg8: memref<64x2xbf16, #tpu.memory_space<vmem>>, %arg9: memref<64x16xbf16, #tpu.memory_space<vmem>>, %arg10: memref<64x16xbf16, #tpu.memory_space<vmem>>, %arg11: memref<2x64xbf16, #tpu.memory_space<vmem>>, %arg12: memref<1x64xf32, #tpu.memory_space<vmem>>, %arg13: memref<16x64xf32, #tpu.memory_space<vmem>>, %arg14: memref<1x64xf32, #tpu.memory_space<vmem>>, %arg15: memref<64x32xbf16, #tpu.memory_space<vmem>>, %arg16: memref<1x8x32xf32, #tpu.memory_space<vmem>>, %arg17: memref<8x64xf32, #tpu.memory_space<vmem>>, %arg18: memref<8x64xf32, #tpu.memory_space<vmem>>, %arg19: memref<8x16xf32, #tpu.memory_space<vmem>>, %arg20: memref<8x16xf32, #tpu.memory_space<vmem>>, %arg21: memref<8x64xf32, #tpu.memory_space<vmem>>, %arg22: memref<8x16x64xf32, #tpu.memory_space<vmem>>) attributes {dimension_semantics = [#tpu.dimension_semantics<parallel>], iteration_bounds = array<i64: 2>, scalar_prefetch = 0 : i64, scratch_operands = 6 : i64, tpu.core_type = #tpu.core_type<tc>, window_params = [{transform_indices = @transform_0, window_bounds = array<i64: 1, 8, 32>}, {transform_indices = @transform_1, window_bounds = array<i64: 1, 8, 32>}, {transform_indices = @transform_2, window_bounds = array<i64: 1, 8, 1>}, {pipeline_mode = #tpu.pipeline_mode<synchronous>, transform_indices = @transform_3, window_bounds = array<i64: 32, 64>}, {pipeline_mode = #tpu.pipeline_mode<synchronous>, transform_indices = @transform_4, window_bounds = array<i64: 32, 64>}, {pipeline_mode = #tpu.pipeline_mode<synchronous>, transform_indices = @transform_5, window_bounds = array<i64: 4, 64>}, {pipeline_mode = #tpu.pipeline_mode<synchronous>, transform_indices = @transform_6, window_bounds = array<i64: 1, 64>}, {pipeline_mode = #tpu.pipeline_mode<synchronous>, transform_indices = @transform_7, window_bounds = array<i64: 64, 2>}, {pipeline_mode = #tpu.pipeline_mode<synchronous>, transform_indices = @transform_8, window_bounds = array<i64: 64, 16>}, {pipeline_mode = #tpu.pipeline_mode<synchronous>, transform_indices = @transform_9, window_bounds = array<i64: 64, 16>}, {pipeline_mode = #tpu.pipeline_mode<synchronous>, transform_indices = @transform_10, window_bounds = array<i64: 2, 64>}, {pipeline_mode = #tpu.pipeline_mode<synchronous>, transform_indices = @transform_11, window_bounds = array<i64: 1, 64>}, {pipeline_mode = #tpu.pipeline_mode<synchronous>, transform_indices = @transform_12, window_bounds = array<i64: 16, 64>}, {pipeline_mode = #tpu.pipeline_mode<synchronous>, transform_indices = @transform_13, window_bounds = array<i64: 1, 64>}, {pipeline_mode = #tpu.pipeline_mode<synchronous>, transform_indices = @transform_14, window_bounds = array<i64: 64, 32>}, {transform_indices = @transform_15, window_bounds = array<i64: 1, 8, 32>}]} {
    %c0 = arith.constant 0 : index
    %c0_0 = arith.constant 0 : index
    %c0_1 = arith.constant 0 : index
    %0 = vector.load %arg1[%c0, %c0_0, %c0_1] : memref<1x8x32xf32, #tpu.memory_space<vmem>>, vector<1x8x32xf32>
    %c0_2 = arith.constant 0 : index
    %c0_3 = arith.constant 0 : index
    %c0_4 = arith.constant 0 : index
    %1 = vector.load %arg2[%c0_2, %c0_3, %c0_4] : memref<1x8x32xf32, #tpu.memory_space<vmem>>, vector<1x8x32xf32>
    %2 = arith.addf %0, %1 : vector<1x8x32xf32>
    %3 = vector.shape_cast %2 : vector<1x8x32xf32> to vector<8x32xf32>
    %4 = arith.truncf %3 : vector<8x32xf32> to vector<8x32xbf16>
    %c0_5 = arith.constant 0 : index
    %c0_6 = arith.constant 0 : index
    %5 = vector.load %arg4[%c0_5, %c0_6] : memref<32x64xbf16, #tpu.memory_space<vmem>>, vector<32x64xbf16>
    %cst = arith.constant dense<0.000000e+00> : vector<8x64xf32>
    %6 = tpu.matmul %4, %5, %cst {dimension_numbers = #tpu.dot_dimension_numbers<[1], [0], [0], [1], [0, 0, 1, 1], [], []>} : vector<8x32xbf16>, vector<32x64xbf16>, vector<8x64xf32> -> vector<8x64xf32>
    %c0_7 = arith.constant 0 : index
    %c0_8 = arith.constant 0 : index
    %7 = vector.load %arg5[%c0_7, %c0_8] : memref<32x64xbf16, #tpu.memory_space<vmem>>, vector<32x64xbf16>
    %cst_9 = arith.constant dense<0.000000e+00> : vector<8x64xf32>
    %8 = tpu.matmul %4, %7, %cst_9 {dimension_numbers = #tpu.dot_dimension_numbers<[1], [0], [0], [1], [0, 0, 1, 1], [], []>} : vector<8x32xbf16>, vector<32x64xbf16>, vector<8x64xf32> -> vector<8x64xf32>
    %9 = tpu.iota {dimensions = array<i32: 0>} : vector<8x64xi32>
    %c3 = arith.constant 3 : index
    %c0_10 = arith.constant 0 : index
    %10 = vector.load %arg6[%c3, %c0_10] : memref<4x64xf32, #tpu.memory_space<vmem>>, vector<1x64xf32>
    %11 = vector.broadcast %10 : vector<1x64xf32> to vector<8x64xf32>
    %12 = arith.mulf %6, %11 : vector<8x64xf32>
    %c3_i32 = arith.constant 3 : i32
    %13 = tpu.dynamic_rotate %6 by %c3_i32 dim 0 : vector<8x64xf32>, i32 -> vector<8x64xf32>
    %c3_i32_11 = arith.constant 3 : i32
    %14 = vector.broadcast %c3_i32_11 : i32 to vector<8x64xi32>
    %15 = arith.cmpi sge, %9, %14 : vector<8x64xi32>
    %cst_12 = arith.constant 0.000000e+00 : f32
    %16 = vector.broadcast %cst_12 : f32 to vector<8x64xf32>
    %17 = arith.select %15, %13, %16 : vector<8x64xi1>, vector<8x64xf32>
    %c0_13 = arith.constant 0 : index
    %c0_14 = arith.constant 0 : index
    %18 = vector.load %arg6[%c0_13, %c0_14] : memref<4x64xf32, #tpu.memory_space<vmem>>, vector<1x64xf32>
    %19 = vector.broadcast %18 : vector<1x64xf32> to vector<8x64xf32>
    %20 = arith.mulf %17, %19 : vector<8x64xf32>
    %21 = arith.addf %12, %20 : vector<8x64xf32>
    %c2_i32 = arith.constant 2 : i32
    %22 = tpu.dynamic_rotate %6 by %c2_i32 dim 0 : vector<8x64xf32>, i32 -> vector<8x64xf32>
    %c2_i32_15 = arith.constant 2 : i32
    %23 = vector.broadcast %c2_i32_15 : i32 to vector<8x64xi32>
    %24 = arith.cmpi sge, %9, %23 : vector<8x64xi32>
    %cst_16 = arith.constant 0.000000e+00 : f32
    %25 = vector.broadcast %cst_16 : f32 to vector<8x64xf32>
    %26 = arith.select %24, %22, %25 : vector<8x64xi1>, vector<8x64xf32>
    %c1 = arith.constant 1 : index
    %c0_17 = arith.constant 0 : index
    %27 = vector.load %arg6[%c1, %c0_17] : memref<4x64xf32, #tpu.memory_space<vmem>>, vector<1x64xf32>
    %28 = vector.broadcast %27 : vector<1x64xf32> to vector<8x64xf32>
    %29 = arith.mulf %26, %28 : vector<8x64xf32>
    %30 = arith.addf %21, %29 : vector<8x64xf32>
    %c1_i32 = arith.constant 1 : i32
    %31 = tpu.dynamic_rotate %6 by %c1_i32 dim 0 : vector<8x64xf32>, i32 -> vector<8x64xf32>
    %c1_i32_18 = arith.constant 1 : i32
    %32 = vector.broadcast %c1_i32_18 : i32 to vector<8x64xi32>
    %33 = arith.cmpi sge, %9, %32 : vector<8x64xi32>
    %cst_19 = arith.constant 0.000000e+00 : f32
    %34 = vector.broadcast %cst_19 : f32 to vector<8x64xf32>
    %35 = arith.select %33, %31, %34 : vector<8x64xi1>, vector<8x64xf32>
    %c2 = arith.constant 2 : index
    %c0_20 = arith.constant 0 : index
    %36 = vector.load %arg6[%c2, %c0_20] : memref<4x64xf32, #tpu.memory_space<vmem>>, vector<1x64xf32>
    %37 = vector.broadcast %36 : vector<1x64xf32> to vector<8x64xf32>
    %38 = arith.mulf %35, %37 : vector<8x64xf32>
    %39 = arith.addf %30, %38 : vector<8x64xf32>
    %c0_21 = arith.constant 0 : index
    %c0_22 = arith.constant 0 : index
    %40 = vector.load %arg7[%c0_21, %c0_22] : memref<1x64xf32, #tpu.memory_space<vmem>>, vector<1x64xf32>
    %41 = vector.broadcast %40 : vector<1x64xf32> to vector<8x64xf32>
    %42 = arith.addf %39, %41 : vector<8x64xf32>
    %43 = arith.negf %42 : vector<8x64xf32>
    %44 = math.exp %43 : vector<8x64xf32>
    %cst_23 = arith.constant 1.000000e+00 : f32
    %45 = vector.broadcast %cst_23 : f32 to vector<8x64xf32>
    %46 = arith.addf %45, %44 : vector<8x64xf32>
    %47 = arith.divf %45, %46 : vector<8x64xf32>
    %48 = arith.mulf %42, %47 : vector<8x64xf32>
    %49 = arith.truncf %48 : vector<8x64xf32> to vector<8x64xbf16>
    %c0_24 = arith.constant 0 : index
    %c0_25 = arith.constant 0 : index
    %50 = vector.load %arg8[%c0_24, %c0_25] : memref<64x2xbf16, #tpu.memory_space<vmem>>, vector<64x2xbf16>
    %cst_26 = arith.constant dense<0.000000e+00> : vector<8x2xf32>
    %51 = tpu.matmul %49, %50, %cst_26 {dimension_numbers = #tpu.dot_dimension_numbers<[1], [0], [0], [1], [0, 0, 1, 1], [], []>} : vector<8x64xbf16>, vector<64x2xbf16>, vector<8x2xf32> -> vector<8x2xf32>
    %c0_27 = arith.constant 0 : index
    %c0_28 = arith.constant 0 : index
    %52 = vector.load %arg9[%c0_27, %c0_28] : memref<64x16xbf16, #tpu.memory_space<vmem>>, vector<64x16xbf16>
    %cst_29 = arith.constant dense<0.000000e+00> : vector<8x16xf32>
    %53 = tpu.matmul %49, %52, %cst_29 {dimension_numbers = #tpu.dot_dimension_numbers<[1], [0], [0], [1], [0, 0, 1, 1], [], []>} : vector<8x64xbf16>, vector<64x16xbf16>, vector<8x16xf32> -> vector<8x16xf32>
    %c0_30 = arith.constant 0 : index
    %c0_31 = arith.constant 0 : index
    %54 = vector.load %arg10[%c0_30, %c0_31] : memref<64x16xbf16, #tpu.memory_space<vmem>>, vector<64x16xbf16>
    %cst_32 = arith.constant dense<0.000000e+00> : vector<8x16xf32>
    %55 = tpu.matmul %49, %54, %cst_32 {dimension_numbers = #tpu.dot_dimension_numbers<[1], [0], [0], [1], [0, 0, 1, 1], [], []>} : vector<8x64xbf16>, vector<64x16xbf16>, vector<8x16xf32> -> vector<8x16xf32>
    %56 = arith.truncf %51 : vector<8x2xf32> to vector<8x2xbf16>
    %c0_33 = arith.constant 0 : index
    %c0_34 = arith.constant 0 : index
    %57 = vector.load %arg11[%c0_33, %c0_34] : memref<2x64xbf16, #tpu.memory_space<vmem>>, vector<2x64xbf16>
    %cst_35 = arith.constant dense<0.000000e+00> : vector<8x64xf32>
    %58 = tpu.matmul %56, %57, %cst_35 {dimension_numbers = #tpu.dot_dimension_numbers<[1], [0], [0], [1], [0, 0, 1, 1], [], []>} : vector<8x2xbf16>, vector<2x64xbf16>, vector<8x64xf32> -> vector<8x64xf32>
    %c0_36 = arith.constant 0 : index
    %c0_37 = arith.constant 0 : index
    %59 = vector.load %arg12[%c0_36, %c0_37] : memref<1x64xf32, #tpu.memory_space<vmem>>, vector<1x64xf32>
    %60 = vector.broadcast %59 : vector<1x64xf32> to vector<8x64xf32>
    %61 = arith.addf %58, %60 : vector<8x64xf32>
    %cst_38 = arith.constant 0.000000e+00 : f32
    %62 = vector.broadcast %cst_38 : f32 to vector<8x64xf32>
    %63 = arith.maximumf %61, %62 : vector<8x64xf32>
    %64 = math.absf %61 : vector<8x64xf32>
    %cst_39 = arith.constant 0.000000e+00 : f32
    %65 = vector.broadcast %cst_39 : f32 to vector<8x64xf32>
    %66 = arith.subf %65, %64 : vector<8x64xf32>
    %67 = math.exp %66 : vector<8x64xf32>
    %cst_40 = arith.constant 1.000000e+00 : f32
    %68 = vector.broadcast %cst_40 : f32 to vector<8x64xf32>
    %69 = arith.addf %68, %67 : vector<8x64xf32>
    %70 = math.log %69 : vector<8x64xf32>
    %71 = arith.addf %63, %70 : vector<8x64xf32>
    %c0_41 = arith.constant 0 : index
    %c0_42 = arith.constant 0 : index
    %72 = vector.load %arg17[%c0_41, %c0_42] : memref<8x64xf32, #tpu.memory_space<vmem>>, vector<8x64xf32>
    tpu.vector_store %arg17[%c0_41, %c0_42], %71 {strides = array<i32>} : memref<8x64xf32, #tpu.memory_space<vmem>>, vector<8x64xf32>,
    %73 = arith.mulf %71, %48 : vector<8x64xf32>
    %c0_43 = arith.constant 0 : index
    %c0_44 = arith.constant 0 : index
    %74 = vector.load %arg18[%c0_43, %c0_44] : memref<8x64xf32, #tpu.memory_space<vmem>>, vector<8x64xf32>
    tpu.vector_store %arg18[%c0_43, %c0_44], %73 {strides = array<i32>} : memref<8x64xf32, #tpu.memory_space<vmem>>, vector<8x64xf32>,
    %c0_45 = arith.constant 0 : index
    %c0_46 = arith.constant 0 : index
    %75 = vector.load %arg19[%c0_45, %c0_46] : memref<8x16xf32, #tpu.memory_space<vmem>>, vector<8x16xf32>
    tpu.vector_store %arg19[%c0_45, %c0_46], %53 {strides = array<i32>} : memref<8x16xf32, #tpu.memory_space<vmem>>, vector<8x16xf32>,
    %c0_47 = arith.constant 0 : index
    %c0_48 = arith.constant 0 : index
    %76 = vector.load %arg20[%c0_47, %c0_48] : memref<8x16xf32, #tpu.memory_space<vmem>>, vector<8x16xf32>
    tpu.vector_store %arg20[%c0_47, %c0_48], %55 {strides = array<i32>} : memref<8x16xf32, #tpu.memory_space<vmem>>, vector<8x16xf32>,
    %c0_49 = arith.constant 0 : index
    %c0_50 = arith.constant 0 : index
    %77 = vector.load %arg13[%c0_49, %c0_50] : memref<16x64xf32, #tpu.memory_space<vmem>>, vector<16x64xf32>
    %78 = tpu.iota {dimensions = array<i32: 0>} : vector<16x16xi32>
    %79 = tpu.iota {dimensions = array<i32: 1>} : vector<16x16xi32>
    %80 = arith.cmpi eq, %78, %79 : vector<16x16xi32>
    %81 = arith.extui %80 : vector<16x16xi1> to vector<16x16xi32>
    %82 = arith.sitofp %81 : vector<16x16xi32> to vector<16x16xf32>
    %c0_i32 = arith.constant 0 : i32
    %cst_51 = arith.constant 0.000000e+00 : f32
    %83 = vector.broadcast %cst_51 : f32 to vector<16x64xf32>
    %c0_i32_52 = arith.constant 0 : i32
    %c8_i32 = arith.constant 8 : i32
    %84 = arith.muli %c0_i32, %c8_i32 : i32
    %c8_i32_53 = arith.constant 8 : i32
    %85 = arith.muli %c0_i32_52, %c8_i32_53 : i32
    %86 = arith.addi %84, %85 : i32
    %c0_i32_54 = arith.constant 0 : i32
    %c8_i32_55 = arith.constant 8 : i32
    %87 = arith.addi %c0_i32_54, %c8_i32_55 : i32
    %c1_i32_56 = arith.constant 1 : i32
    scf.for %arg23 = %c0_i32_54 to %87 step %c1_i32_56  : i32 {
      %111 = arith.addi %86, %arg23 : i32
      %112 = arith.index_cast %111 : i32 to index
      %c0_78 = arith.constant 0 : index
      %113 = vector.load %arg17[%112, %c0_78] : memref<8x64xf32, #tpu.memory_space<vmem>>, vector<1x64xf32>
      %114 = vector.broadcast %113 : vector<1x64xf32> to vector<16x64xf32>
      %115 = arith.mulf %77, %114 : vector<16x64xf32>
      %116 = math.exp %115 : vector<16x64xf32>
      %117 = arith.index_cast %arg23 : i32 to index
      %c0_79 = arith.constant 0 : index
      %c0_80 = arith.constant 0 : index
      %118 = vector.load %arg22[%117, %c0_79, %c0_80] : memref<8x16x64xf32, #tpu.memory_space<vmem>>, vector<1x16x64xf32>
      %119 = vector.shape_cast %118 : vector<1x16x64xf32> to vector<16x64xf32>
      %120 = vector.shape_cast %116 : vector<16x64xf32> to vector<1x16x64xf32>
      tpu.vector_store %arg22[%117, %c0_79, %c0_80], %120 {strides = array<i32>} : memref<8x16x64xf32, #tpu.memory_space<vmem>>, vector<1x16x64xf32>,
    }
    %c8_i32_57 = arith.constant 8 : i32
    %c0_i32_58 = arith.constant 0 : i32
    %c8_i32_59 = arith.constant 8 : i32
    %88 = arith.addi %c0_i32_58, %c8_i32_59 : i32
    %c1_i32_60 = arith.constant 1 : i32
    %89 = scf.for %arg23 = %c0_i32_58 to %88 step %c1_i32_60 iter_args(%arg24 = %83) -> (vector<16x64xf32>)  : i32 {
      %111 = arith.addi %86, %arg23 : i32
      %112 = arith.index_cast %111 : i32 to index
      %c0_78 = arith.constant 0 : index
      %113 = vector.load %arg18[%112, %c0_78] : memref<8x64xf32, #tpu.memory_space<vmem>>, vector<1x64xf32>
      %114 = arith.index_cast %111 : i32 to index
      %c0_79 = arith.constant 0 : index
      %115 = vector.load %arg19[%114, %c0_79] : memref<8x16xf32, #tpu.memory_space<vmem>>, vector<1x16xf32>
      %116 = arith.index_cast %111 : i32 to index
      %c0_80 = arith.constant 0 : index
      %117 = vector.load %arg20[%116, %c0_80] : memref<8x16xf32, #tpu.memory_space<vmem>>, vector<1x16xf32>
      %118 = vector.broadcast %115 : vector<1x16xf32> to vector<16x16xf32>
      %119 = arith.mulf %118, %82 : vector<16x16xf32>
      %cst_81 = arith.constant dense<0.000000e+00> : vector<16xf32>
      %120 = vector.multi_reduction <add>, %119, %cst_81 [1] : vector<16x16xf32> to vector<16xf32>
      %121 = vector.shape_cast %120 : vector<16xf32> to vector<16x1xf32>
      %122 = vector.broadcast %117 : vector<1x16xf32> to vector<16x16xf32>
      %123 = arith.mulf %122, %82 : vector<16x16xf32>
      %cst_82 = arith.constant dense<0.000000e+00> : vector<16xf32>
      %124 = vector.multi_reduction <add>, %123, %cst_82 [1] : vector<16x16xf32> to vector<16xf32>
      %125 = vector.shape_cast %124 : vector<16xf32> to vector<16x1xf32>
      %126 = arith.index_cast %arg23 : i32 to index
      %c0_83 = arith.constant 0 : index
      %c0_84 = arith.constant 0 : index
      %127 = vector.load %arg22[%126, %c0_83, %c0_84] : memref<8x16x64xf32, #tpu.memory_space<vmem>>, vector<1x16x64xf32>
      %128 = vector.shape_cast %127 : vector<1x16x64xf32> to vector<16x64xf32>
      %129 = arith.mulf %arg24, %128 : vector<16x64xf32>
      %130 = vector.broadcast %121 : vector<16x1xf32> to vector<16x64xf32>
      %131 = vector.broadcast %113 : vector<1x64xf32> to vector<16x64xf32>
      %132 = arith.mulf %130, %131 : vector<16x64xf32>
      %133 = arith.addf %129, %132 : vector<16x64xf32>
      %134 = vector.broadcast %125 : vector<16x1xf32> to vector<16x64xf32>
      %135 = arith.mulf %133, %134 : vector<16x64xf32>
      %cst_85 = arith.constant dense<0.000000e+00> : vector<64xf32>
      %136 = vector.multi_reduction <add>, %135, %cst_85 [0] : vector<16x64xf32> to vector<64xf32>
      %137 = vector.shape_cast %136 : vector<64xf32> to vector<1x64xf32>
      %138 = arith.index_cast %111 : i32 to index
      %c0_86 = arith.constant 0 : index
      %139 = vector.load %arg21[%138, %c0_86] : memref<8x64xf32, #tpu.memory_space<vmem>>, vector<1x64xf32>
      tpu.vector_store %arg21[%138, %c0_86], %137 {strides = array<i32>} : memref<8x64xf32, #tpu.memory_space<vmem>>, vector<1x64xf32>,
      scf.yield %133 : vector<16x64xf32>
    }
    %c8_i32_61 = arith.constant 8 : i32
    %c1_i32_62 = arith.constant 1 : i32
    %c1_i32_63 = arith.constant 1 : i32
    %c0_64 = arith.constant 0 : index
    %c0_65 = arith.constant 0 : index
    %90 = vector.load %arg21[%c0_64, %c0_65] : memref<8x64xf32, #tpu.memory_space<vmem>>, vector<8x64xf32>
    %c0_66 = arith.constant 0 : index
    %c0_67 = arith.constant 0 : index
    %91 = vector.load %arg14[%c0_66, %c0_67] : memref<1x64xf32, #tpu.memory_space<vmem>>, vector<1x64xf32>
    %92 = vector.broadcast %91 : vector<1x64xf32> to vector<8x64xf32>
    %93 = arith.mulf %92, %48 : vector<8x64xf32>
    %94 = arith.addf %90, %93 : vector<8x64xf32>
    %95 = arith.negf %8 : vector<8x64xf32>
    %96 = math.exp %95 : vector<8x64xf32>
    %cst_68 = arith.constant 1.000000e+00 : f32
    %97 = vector.broadcast %cst_68 : f32 to vector<8x64xf32>
    %98 = arith.addf %97, %96 : vector<8x64xf32>
    %99 = arith.divf %97, %98 : vector<8x64xf32>
    %100 = arith.mulf %8, %99 : vector<8x64xf32>
    %101 = arith.mulf %94, %100 : vector<8x64xf32>
    %102 = arith.truncf %101 : vector<8x64xf32> to vector<8x64xbf16>
    %c0_69 = arith.constant 0 : index
    %c0_70 = arith.constant 0 : index
    %103 = vector.load %arg15[%c0_69, %c0_70] : memref<64x32xbf16, #tpu.memory_space<vmem>>, vector<64x32xbf16>
    %cst_71 = arith.constant dense<0.000000e+00> : vector<8x32xf32>
    %104 = tpu.matmul %102, %103, %cst_71 {dimension_numbers = #tpu.dot_dimension_numbers<[1], [0], [0], [1], [0, 0, 1, 1], [], []>} : vector<8x64xbf16>, vector<64x32xbf16>, vector<8x32xf32> -> vector<8x32xf32>
    %c0_72 = arith.constant 0 : index
    %c0_73 = arith.constant 0 : index
    %c0_74 = arith.constant 0 : index
    %105 = vector.load %arg3[%c0_72, %c0_73, %c0_74] : memref<1x8x1xf32, #tpu.memory_space<vmem>>, vector<1x8x1xf32>
    %106 = vector.shape_cast %105 : vector<1x8x1xf32> to vector<8x1xf32>
    %107 = vector.broadcast %106 : vector<8x1xf32> to vector<8x32xf32>
    %108 = arith.mulf %104, %107 : vector<8x32xf32>
    %109 = vector.shape_cast %108 : vector<8x32xf32> to vector<1x8x32xf32>
    %c0_75 = arith.constant 0 : index
    %c0_76 = arith.constant 0 : index
    %c0_77 = arith.constant 0 : index
    %110 = vector.load %arg16[%c0_75, %c0_76, %c0_77] : memref<1x8x32xf32, #tpu.memory_space<vmem>>, vector<1x8x32xf32>
    tpu.vector_store %arg16[%c0_75, %c0_76, %c0_77], %109 {strides = array<i32>} : memref<1x8x32xf32, #tpu.memory_space<vmem>>, vector<1x8x32xf32>,
    return
  }
  func.func @transform_0(%arg0: i32) -> (i32, i32, i32) {
    %c0_i32 = arith.constant 0 : i32
    %c0_i32_0 = arith.constant 0 : i32
    %c0_i32_1 = arith.constant 0 : i32
    return %arg0, %c0_i32, %c0_i32_0 : i32, i32, i32
  }
  func.func @transform_1(%arg0: i32) -> (i32, i32, i32) {
    %c0_i32 = arith.constant 0 : i32
    %c0_i32_0 = arith.constant 0 : i32
    %c0_i32_1 = arith.constant 0 : i32
    return %arg0, %c0_i32, %c0_i32_0 : i32, i32, i32
  }
  func.func @transform_2(%arg0: i32) -> (i32, i32, i32) {
    %c0_i32 = arith.constant 0 : i32
    %c0_i32_0 = arith.constant 0 : i32
    %c0_i32_1 = arith.constant 0 : i32
    return %arg0, %c0_i32, %c0_i32_0 : i32, i32, i32
  }
  func.func @transform_3(%arg0: i32) -> (i32, i32) {
    %c0_i32 = arith.constant 0 : i32
    %c0_i32_0 = arith.constant 0 : i32
    %c0_i32_1 = arith.constant 0 : i32
    return %c0_i32, %c0_i32_0 : i32, i32
  }
  func.func @transform_4(%arg0: i32) -> (i32, i32) {
    %c0_i32 = arith.constant 0 : i32
    %c0_i32_0 = arith.constant 0 : i32
    %c0_i32_1 = arith.constant 0 : i32
    return %c0_i32, %c0_i32_0 : i32, i32
  }
  func.func @transform_5(%arg0: i32) -> (i32, i32) {
    %c0_i32 = arith.constant 0 : i32
    %c0_i32_0 = arith.constant 0 : i32
    %c0_i32_1 = arith.constant 0 : i32
    return %c0_i32, %c0_i32_0 : i32, i32
  }
  func.func @transform_6(%arg0: i32) -> (i32, i32) {
    %c0_i32 = arith.constant 0 : i32
    %c0_i32_0 = arith.constant 0 : i32
    %c0_i32_1 = arith.constant 0 : i32
    return %c0_i32, %c0_i32_0 : i32, i32
  }
  func.func @transform_7(%arg0: i32) -> (i32, i32) {
    %c0_i32 = arith.constant 0 : i32
    %c0_i32_0 = arith.constant 0 : i32
    %c0_i32_1 = arith.constant 0 : i32
    return %c0_i32, %c0_i32_0 : i32, i32
  }
  func.func @transform_8(%arg0: i32) -> (i32, i32) {
    %c0_i32 = arith.constant 0 : i32
    %c0_i32_0 = arith.constant 0 : i32
    %c0_i32_1 = arith.constant 0 : i32
    return %c0_i32, %c0_i32_0 : i32, i32
  }
  func.func @transform_9(%arg0: i32) -> (i32, i32) {
    %c0_i32 = arith.constant 0 : i32
    %c0_i32_0 = arith.constant 0 : i32
    %c0_i32_1 = arith.constant 0 : i32
    return %c0_i32, %c0_i32_0 : i32, i32
  }
  func.func @transform_10(%arg0: i32) -> (i32, i32) {
    %c0_i32 = arith.constant 0 : i32
    %c0_i32_0 = arith.constant 0 : i32
    %c0_i32_1 = arith.constant 0 : i32
    return %c0_i32, %c0_i32_0 : i32, i32
  }
  func.func @transform_11(%arg0: i32) -> (i32, i32) {
    %c0_i32 = arith.constant 0 : i32
    %c0_i32_0 = arith.constant 0 : i32
    %c0_i32_1 = arith.constant 0 : i32
    return %c0_i32, %c0_i32_0 : i32, i32
  }
  func.func @transform_12(%arg0: i32) -> (i32, i32) {
    %c0_i32 = arith.constant 0 : i32
    %c0_i32_0 = arith.constant 0 : i32
    %c0_i32_1 = arith.constant 0 : i32
    return %c0_i32, %c0_i32_0 : i32, i32
  }
  func.func @transform_13(%arg0: i32) -> (i32, i32) {
    %c0_i32 = arith.constant 0 : i32
    %c0_i32_0 = arith.constant 0 : i32
    %c0_i32_1 = arith.constant 0 : i32
    return %c0_i32, %c0_i32_0 : i32, i32
  }
  func.func @transform_14(%arg0: i32) -> (i32, i32) {
    %c0_i32 = arith.constant 0 : i32
    %c0_i32_0 = arith.constant 0 : i32
    %c0_i32_1 = arith.constant 0 : i32
    return %c0_i32, %c0_i32_0 : i32, i32
  }
  func.func @transform_15(%arg0: i32) -> (i32, i32, i32) {
    %c0_i32 = arith.constant 0 : i32
    %c0_i32_0 = arith.constant 0 : i32
    %c0_i32_1 = arith.constant 0 : i32
    return %arg0, %c0_i32, %c0_i32_0 : i32, i32, i32
  }
}

</mosaic_0001>

<bundles_post_ra>
// kernel: encoder_forward.7
= control target key start
LH: loop header
LB: loop body
LE: loop exit
PB: predicated region body
PF: predicated region fallthrough
CT: control target
= control target key end

     0   :  { %v362_v1 = vmov 0.0   ;;  %vm363_vm0 = vmmov 0   ;;  %s474_s0 = inlined_call_operand.vmem [shape: f32[16,32], index: 0, kind: input, shape index: {}]   ;;  %s475_s1 = inlined_call_operand.vmem [shape: f32[16,1], index: 1, kind: input, shape index: {}]   ;;  %s476_s2 = inlined_call_operand.vmem [shape: bf16[32,64], index: 2, kind: input, shape index: {}]   ;;  %s477_s3 = inlined_call_operand.vmem [shape: f32[1,64], index: 3, kind: input, shape index: {}]   ;;  %s478_s4 = inlined_call_operand.vmem [shape: bf16[64,32], index: 4, kind: input, shape index: {}]   ;;  %s479_s5 = inlined_call_operand.vmem [shape: f32[1,32], index: 5, kind: input, shape index: {}]   ;;  %s480_s6 = inlined_call_operand.vmem [shape: f32[1,32], index: 6, kind: input, shape index: {}]   ;;  %s481_s7 = inlined_call_operand.vmem [shape: f32[1,32], index: 7, kind: input, shape index: {}]   ;;  %s482_s8 = inlined_call_operand.hbm [shape: f32[16,32], index: 8, kind: output, shape index: {}]  }
   0x1   :  { %v324_v0 = vld [vmem:[%s476_s2] sm:$0xff]   ;;  %296 = vmatprep.subr.bf16.mxu0 %v362_v1  ;;  %304 = vmatprep.subr.bf16.mxu1 %v362_v1  ;;  %v325_v2 = vld [vmem:[%s476_s2 + $0x8] sm:$0xff]  }
   0x2   :  { %297 = vmatpush3.bf16.msra.mxu0 %v324_v0  ;;  %300 = vmatprep.mubr.msk.bf16.mxu0 %vm363_vm0, %v362_v1  ;;  %v31_v3 = vld [vmem:[%s474_s0] sm:$0xff]  ;;  %v32_v4 = vld [vmem:[%s474_s0 + $0x8] sm:$0xff] }
   0x3   :  { %298 = vmatprep.subr.bf16.mxu0 %v362_v1  ;;  %312 = vmatprep.mubr.msk.bf16.mxu1 %vm363_vm0, %v362_v1  ;;  %v33_v5 = vpack.c.bf16 %v32_v4, %v31_v3 }
   0x4   :  { %13 = vsyncpa [#allocation3], 0  ;;  %vm57_vm1 = vcmask 261120   ;;  %v326_v6 = vld [vmem:[%s478_s4] sm:$0xff]   ;;  %v327_v7 = vld [vmem:[%s478_s4 + $0x8] sm:$0xff]   ;;  %vm152_vm2 = vcmask 523264  }
   0x5   :  { %305 = vmatpush3.bf16.msra.mxu1 %v326_v6  ;;  %v328_v8 = vld [vmem:[%s478_s4 + $0x10] sm:$0xff]   ;;  %v329_v9 = vld [vmem:[%s478_s4 + $0x18] sm:$0xff]   ;;  %v276_v10 = vld [vmem:[%s477_s3] ss:$0 sm:$0xff]  ;;  %v364_v40 = vmov 0  }
   0x6   :  { %299 = vmatpush3.bf16.msra.mxu0 %v325_v2  ;;  %306 = vmatprep.subr.bf16.mxu1 %v362_v1  ;;  %v280_v28 = vld [vmem:[%s479_s5] ss:$0 sm:$0xff]  ;;  %v245_v51 = vld [vmem:[%s475_s1 + $0x8] sm:$0xff] }
   0x7   :  { %v244_v39 = vld [vmem:[%s475_s1] sm:$0xff]  ;;  %322 = vset.pattern.permute.xlu0 %v364_v40  ;;  %323 = vset.pattern.permute.xlu1 %v364_v40  ;;  %s365_s1 = smov [#allocation2]  }
   0x8   :  { %v286_v59 = vld [vmem:[%s480_s6] ss:$0 sm:$0xff]  ;;  %s265_s28 = sshll.u32 %s365_s1, 4  ;;  %s266_s28 = int_to_ptr.vmem [resolvable:$true] %s265_s28 }
   0x9   :  { %301 = vmatmul.mubr.msk.bf16.vlgmr.msra.gmra.mrb[0].mxu0 %vm57_vm1, %v33_v5  ;;  %307 = vmatpush3.bf16.msra.mxu1 %v327_v7  ;;  %v287_v61 = vld [vmem:[%s481_s7] ss:$0 sm:$0xff]  ;;  %s338_s6 = scalar_lea.vmem %s266_s28, 256  ;;  %p343_p1 = scmp.lt.s32.totalorder %s266_s28, %s266_s28 }
   0xa   :  { %308 = vmatprep.subr.bf16.mxu1 %v362_v1  ;;  %p339_p0 = scmp.ne.s32.totalorder %s266_s28, %s338_s6  ;;  %p344_p2 = scmp.lt.s32.totalorder %s338_s6, %s338_s6 }
   0xc   :  { %p345_p3 = por %p344_p2, %p343_p1 }
   0xd   :  { %309 = vmatpush3.bf16.msra.mxu1 %v328_v8 }
   0xe   :  { %310 = vmatprep.subr.bf16.mxu1 %v362_v1  ;;  %p346_p4 = pnand %p345_p3, %p339_p0 }
  0x11   :  { %311 = vmatpush3.bf16.msra.mxu1 %v329_v9 }
  0xdc   :  { %v95_v11 = vpop.f32.mrb[0].mxu0 }
  0xdd   :  { %v96_v12 = vadd.f32 %v276_v10, %v95_v11  ;;  %v302_v13 = vpop.f32.mrb[1].mxu0 }
  0xde   :  { %v98_v14 = vpop.f32.mrb[2].mxu0 }
  0xdf   :  { %v104_v15 = vmul.f32 0.70710677, %v96_v12  ;;  %v99_v16 = vadd.f32 %v276_v10, %v98_v14  ;;  %v303_v17 = vpop.f32.mrb[3].mxu0  ;;  %v102_v22 = vmul.f32 0.5, %v96_v12 }
  0xe1   :  { %330 = verf.f32 %v104_v15  ;;  %v105_v18 = vmul.f32 0.70710677, %v99_v16  ;;  %v103_v23 = vmul.f32 0.5, %v99_v16 }
  0xe3   :  { %332 = verf.f32 %v105_v18 }
  0xeb   :  { %v331_v19 = vpop.eup %330 }
  0xec   :  { %v108_v20 = vadd.f32 1.0, %v331_v19 }
  0xed   :  { %v333_v21 = vpop.eup %332 }
  0xee   :  { %v109_v24 = vadd.f32 1.0, %v333_v21  ;;  %v110_v25 = vmul.f32 %v108_v20, %v102_v22 }
  0xf0   :  { %v111_v26 = vmul.f32 %v109_v24, %v103_v23 }
  0xf2   :  { %v112_v27 = vpack.c.bf16 %v111_v26, %v110_v25 }
  0xf4   :  { %313 = vmatmul.mubr.msk.bf16.vlgmr.msra.gmra.mrb[0].mxu1 %vm152_vm2, %v112_v27 }
 0x1c7   :  { %v190_v29 = vpop.f32.mrb[0].mxu1 }
 0x1c8   :  { %v191_v30 = vadd.f32 %v280_v28, %v190_v29  ;;  %v314_v31 = vpop.f32.mrb[1].mxu1 }
 0x1c9   :  { %v193_v32 = vpop.f32.mrb[2].mxu1 }
 0x1ca   :  { %v194_v33 = vadd.f32 %v280_v28, %v193_v32  ;;  %v315_v34 = vpop.f32.mrb[3].mxu1  ;;  %v197_v35 = vadd.f32 %v191_v30, %v31_v3 }
 0x1cc   :  { %v199_v36 = vsel %vm57_vm1, %v197_v35, 0.0  ;;  %v198_v37 = vadd.f32 %v194_v33, %v32_v4 }
 0x1cd   :  { %200 = vadd.xlane.f32.xlu0 %v199_v36 }
 0x1ce   :  { %v202_v38 = vsel %vm57_vm1, %v198_v37, 0.0 }
 0x1d1   :  { %203 = vadd.xlane.f32.xlu0 %v202_v38 }
 0x1e7   :  { %248 = vperm.xlu0 %322, %v244_v39  }
 0x25a   :  { %v201_v41 = vpop.xlane.xlu0 %200 }
 0x25b   :  { %v206_v42 = vmul.f32 0.03125, %v201_v41 }
 0x25d   :  { %v208_v43 = vsub.f32 %v197_v35, %v206_v42 }
 0x25e   :  { %v204_v44 = vpop.xlane.xlu0 %203 }
 0x25f   :  { %v207_v45 = vmul.f32 0.03125, %v204_v44  ;;  %v210_v46 = vmul.f32 %v208_v43, %v208_v43 }
 0x261   :  { %v209_v47 = vsub.f32 %v198_v37, %v207_v45  ;;  %v212_v48 = vsel %vm57_vm1, %v210_v46, 0.0 }
 0x262   :  { %213 = vadd.xlane.f32.xlu1 %v212_v48 }
 0x263   :  { %v211_v49 = vmul.f32 %v209_v47, %v209_v47 }
 0x265   :  { %v215_v50 = vsel %vm57_vm1, %v211_v49, 0.0 }
 0x266   :  { %216 = vadd.xlane.f32.xlu1 %v215_v50  ;;  %v249_v0 = vpop.permute.xlu0 %248 }
 0x277   :  { %253 = vperm.xlu1 %323, %v245_v51  }
 0x2ef   :  { %v214_v52 = vpop.xlane.xlu1 %213 }
 0x2f0   :  { %v218_v53 = vmul.f32 0.03125, %v214_v52 }
 0x2f2   :  { %v220_v54 = vadd.f32 1e-06, %v218_v53 }
 0x2f3   :  { %v217_v55 = vpop.xlane.xlu1 %216 }
 0x2f4   :  { %334 = vrsqrt.f32 %v220_v54  ;;  %v219_v56 = vmul.f32 0.03125, %v217_v55 }
 0x2f6   :  { %v221_v57 = vadd.f32 1e-06, %v219_v56 }
 0x2f7   :  { %v254_v5 = vpop.permute.xlu1 %253 }
 0x2f8   :  { %336 = vrsqrt.f32 %v221_v57 }
 0x2fe   :  { %v335_v58 = vpop.eup %334 }
 0x2ff   :  { %v224_v60 = vmul.f32 %v335_v58, %v208_v43 }
 0x301   :  { %v233_v62 = vmul.f32 %v286_v59, %v224_v60 }
 0x302   :  { %v337_v63 = vpop.eup %336 }
 0x303   :  { %v242_v1 = vadd.f32 %v287_v61, %v233_v62  ;;  %v225_v2 = vmul.f32 %v337_v63, %v209_v47 }
 0x305   :  { %v256_v3 = vmul.f32 %v249_v0, %v242_v1  ;;  %v234_v4 = vmul.f32 %v286_v59, %v225_v2 }
 0x307   :  { %258 = vst.msk [vmem:[#allocation2] sm:$0xff] %vm57_vm1, %v256_v3  ;;  %v243_v6 = vadd.f32 %v287_v61, %v234_v4 }
 0x309   :  { %v257_v7 = vmul.f32 %v254_v5, %v243_v6 }
 0x30b   :  { %259 = vst.msk [vmem:[#allocation2 + $0x8] sm:$0xff] %vm57_vm1, %v257_v7 }
 0x30c   :  { %349 = shalt.err (!%p346_p4)
}
 0x30d   :  { %s350_s30 = scalar_lea.hbm %s482_s8, 256 }
 0x30e   :  { %p351_p5 = scmp.ne.s32.totalorder %s482_s8, %s350_s30  ;;  %p354_p6 = scmp.lt.u32.totalorder %s350_s30, %s482_s8 }
 0x310   :  { %p356_p7 = pnand %p354_p6, %p351_p5 }
 0x312   :  { %359 = shalt.err (!%p356_p7)
}
 0x313   :  { %s366_s13 = smov 128   ;;  %s367_s2 = smov 8  }
 0x314   :  { %271 = dma.vmem_to_hbm [thread:$0]  %s266_s28, 256, %s482_s8, [#allocation3], %s366_s13, %s366_s13, %s367_s2  }
 0x315   :  { %360 = dma.done.wait [#allocation3], 256  }
 0x316   :  { %361 = vsyncadd [#allocation3], 4294967040 }
 0x317   :  { %275 = vsyncpa [#allocation3], 1 }

// kernel: encoder_forward.5
= control target key start
LH: loop header
LB: loop body
LE: loop exit
PB: predicated region body
PF: predicated region fallthrough
CT: control target
= control target key end

     0   :  { %v322_v0 = vmov 0.0   ;;  %vm323_vm0 = vmmov 0   ;;  %vm56_vm1 = vcmask 261120   ;;  %vm151_vm2 = vcmask 523264   ;;  %s425_s2 = inlined_call_operand.vmem [shape: bf16[32,64], index: 2, kind: input, shape index: {}]   ;;  %s426_s0 = inlined_call_operand.vmem [shape: f32[16,32], index: 0, kind: input, shape index: {}]   ;;  %s427_s4 = inlined_call_operand.vmem [shape: bf16[64,32], index: 4, kind: input, shape index: {}]   ;;  %s428_s3 = inlined_call_operand.vmem [shape: f32[1,64], index: 3, kind: input, shape index: {}]   ;;  %s429_s5 = inlined_call_operand.vmem [shape: f32[1,32], index: 5, kind: input, shape index: {}]   ;;  %s430_s1 = inlined_call_operand.vmem [shape: f32[16,1], index: 1, kind: input, shape index: {}]   ;;  %s431_s6 = inlined_call_operand.vmem [shape: f32[1,32], index: 6, kind: input, shape index: {}]   ;;  %s432_s7 = inlined_call_operand.vmem [shape: f32[1,32], index: 7, kind: input, shape index: {}]   ;;  %s433_s8 = inlined_call_operand.vmem [shape: f32[16,32], index: 8, kind: output, shape index: {}]  }
   0x1   :  { %283 = vmatprep.subr.bf16.mxu0 %v322_v0  ;;  %v308_v1 = vld [vmem:[%s425_s2] sm:$0xff]   ;;  %287 = vmatprep.mubr.msk.bf16.mxu0 %vm323_vm0, %v322_v0  ;;  %v309_v2 = vld [vmem:[%s425_s2 + $0x8] sm:$0xff]   ;;  %v312_v8 = vld [vmem:[%s427_s4 + $0x10] sm:$0xff]   ;;  %v324_v39 = vmov 0  }
   0x2   :  { %291 = vmatprep.subr.bf16.mxu1 %v322_v0  ;;  %299 = vmatprep.mubr.msk.bf16.mxu1 %vm323_vm0, %v322_v0  ;;  %v30_v3 = vld [vmem:[%s426_s0] sm:$0xff]  ;;  %v31_v4 = vld [vmem:[%s426_s0 + $0x8] sm:$0xff]  ;;  %v313_v9 = vld [vmem:[%s427_s4 + $0x18] sm:$0xff]  }
   0x3   :  { %284 = vmatpush3.bf16.msra.mxu0 %v308_v1  ;;  %v32_v5 = vpack.c.bf16 %v31_v4, %v30_v3  ;;  %v310_v6 = vld [vmem:[%s427_s4] sm:$0xff]   ;;  %v311_v7 = vld [vmem:[%s427_s4 + $0x8] sm:$0xff]   ;;  %306 = vset.pattern.permute.xlu0 %v324_v39 }
   0x4   :  { %285 = vmatprep.subr.bf16.mxu0 %v322_v0  ;;  %292 = vmatpush3.bf16.msra.mxu1 %v310_v6  ;;  %v263_v10 = vld [vmem:[%s428_s3] ss:$0 sm:$0xff]  ;;  %v244_v51 = vld [vmem:[%s430_s1 + $0x8] sm:$0xff] }
   0x5   :  { %293 = vmatprep.subr.bf16.mxu1 %v322_v0  ;;  %v267_v28 = vld [vmem:[%s429_s5] ss:$0 sm:$0xff]  ;;  %307 = vset.pattern.permute.xlu1 %v324_v39 }
   0x6   :  { %v243_v40 = vld [vmem:[%s430_s1] sm:$0xff] }
   0x7   :  { %286 = vmatpush3.bf16.msra.mxu0 %v309_v2  ;;  %v273_v59 = vld [vmem:[%s431_s6] ss:$0 sm:$0xff] }
   0x8   :  { %294 = vmatpush3.bf16.msra.mxu1 %v311_v7  ;;  %v274_v61 = vld [vmem:[%s432_s7] ss:$0 sm:$0xff] }
   0x9   :  { %295 = vmatprep.subr.bf16.mxu1 %v322_v0 }
   0xa   :  { %288 = vmatmul.mubr.msk.bf16.vlgmr.msra.gmra.mrb[0].mxu0 %vm56_vm1, %v32_v5 }
   0xc   :  { %296 = vmatpush3.bf16.msra.mxu1 %v312_v8 }
   0xd   :  { %297 = vmatprep.subr.bf16.mxu1 %v322_v0 }
  0x10   :  { %298 = vmatpush3.bf16.msra.mxu1 %v313_v9 }
  0xdd   :  { %v94_v11 = vpop.f32.mrb[0].mxu0 }
  0xde   :  { %v95_v12 = vadd.f32 %v263_v10, %v94_v11  ;;  %v289_v13 = vpop.f32.mrb[1].mxu0 }
  0xdf   :  { %v97_v14 = vpop.f32.mrb[2].mxu0 }
  0xe0   :  { %v103_v15 = vmul.f32 0.70710677, %v95_v12  ;;  %v98_v16 = vadd.f32 %v263_v10, %v97_v14  ;;  %v290_v17 = vpop.f32.mrb[3].mxu0  ;;  %v101_v22 = vmul.f32 0.5, %v95_v12 }
  0xe2   :  { %314 = verf.f32 %v103_v15  ;;  %v104_v18 = vmul.f32 0.70710677, %v98_v16  ;;  %v102_v23 = vmul.f32 0.5, %v98_v16 }
  0xe4   :  { %316 = verf.f32 %v104_v18 }
  0xec   :  { %v315_v19 = vpop.eup %314 }
  0xed   :  { %v107_v20 = vadd.f32 1.0, %v315_v19 }
  0xee   :  { %v317_v21 = vpop.eup %316 }
  0xef   :  { %v108_v24 = vadd.f32 1.0, %v317_v21  ;;  %v109_v25 = vmul.f32 %v107_v20, %v101_v22 }
  0xf1   :  { %v110_v26 = vmul.f32 %v108_v24, %v102_v23 }
  0xf3   :  { %v111_v27 = vpack.c.bf16 %v110_v26, %v109_v25 }
  0xf5   :  { %300 = vmatmul.mubr.msk.bf16.vlgmr.msra.gmra.mrb[0].mxu1 %vm151_vm2, %v111_v27 }
 0x1c8   :  { %v189_v29 = vpop.f32.mrb[0].mxu1 }
 0x1c9   :  { %v190_v30 = vadd.f32 %v267_v28, %v189_v29  ;;  %v301_v31 = vpop.f32.mrb[1].mxu1 }
 0x1ca   :  { %v192_v32 = vpop.f32.mrb[2].mxu1 }
 0x1cb   :  { %v193_v33 = vadd.f32 %v267_v28, %v192_v32  ;;  %v302_v34 = vpop.f32.mrb[3].mxu1  ;;  %v196_v35 = vadd.f32 %v190_v30, %v30_v3 }
 0x1cd   :  { %v198_v36 = vsel %vm56_vm1, %v196_v35, 0.0  ;;  %v197_v37 = vadd.f32 %v193_v33, %v31_v4 }
 0x1ce   :  { %199 = vadd.xlane.f32.xlu0 %v198_v36 }
 0x1cf   :  { %v201_v38 = vsel %vm56_vm1, %v197_v37, 0.0 }
 0x1d2   :  { %202 = vadd.xlane.f32.xlu0 %v201_v38 }
 0x1e8   :  { %247 = vperm.xlu0 %306, %v243_v40  }
 0x25b   :  { %v200_v41 = vpop.xlane.xlu0 %199 }
 0x25c   :  { %v205_v42 = vmul.f32 0.03125, %v200_v41 }
 0x25e   :  { %v207_v43 = vsub.f32 %v196_v35, %v205_v42 }
 0x25f   :  { %v203_v44 = vpop.xlane.xlu0 %202 }
 0x260   :  { %v206_v45 = vmul.f32 0.03125, %v203_v44  ;;  %v209_v46 = vmul.f32 %v207_v43, %v207_v43 }
 0x262   :  { %v208_v47 = vsub.f32 %v197_v37, %v206_v45  ;;  %v211_v48 = vsel %vm56_vm1, %v209_v46, 0.0 }
 0x263   :  { %212 = vadd.xlane.f32.xlu1 %v211_v48 }
 0x264   :  { %v210_v49 = vmul.f32 %v208_v47, %v208_v47 }
 0x266   :  { %v214_v50 = vsel %vm56_vm1, %v210_v49, 0.0 }
 0x267   :  { %215 = vadd.xlane.f32.xlu1 %v214_v50  ;;  %v248_v0 = vpop.permute.xlu0 %247 }
 0x278   :  { %252 = vperm.xlu1 %307, %v244_v51  }
 0x2f0   :  { %v213_v52 = vpop.xlane.xlu1 %212 }
 0x2f1   :  { %v217_v53 = vmul.f32 0.03125, %v213_v52 }
 0x2f3   :  { %v219_v54 = vadd.f32 1e-06, %v217_v53 }
 0x2f4   :  { %v216_v55 = vpop.xlane.xlu1 %215 }
 0x2f5   :  { %318 = vrsqrt.f32 %v219_v54  ;;  %v218_v56 = vmul.f32 0.03125, %v216_v55 }
 0x2f7   :  { %v220_v57 = vadd.f32 1e-06, %v218_v56 }
 0x2f8   :  { %v253_v5 = vpop.permute.xlu1 %252 }
 0x2f9   :  { %320 = vrsqrt.f32 %v220_v57 }
 0x2ff   :  { %v319_v58 = vpop.eup %318 }
 0x300   :  { %v223_v60 = vmul.f32 %v319_v58, %v207_v43 }
 0x302   :  { %v232_v62 = vmul.f32 %v273_v59, %v223_v60 }
 0x303   :  { %v321_v63 = vpop.eup %320 }
 0x304   :  { %v241_v1 = vadd.f32 %v274_v61, %v232_v62  ;;  %v224_v2 = vmul.f32 %v321_v63, %v208_v47 }
 0x306   :  { %v255_v3 = vmul.f32 %v248_v0, %v241_v1  ;;  %v233_v4 = vmul.f32 %v273_v59, %v224_v2 }
 0x308   :  { %257 = vst.msk [vmem:[%s433_s8] sm:$0xff] %vm56_vm1, %v255_v3  ;;  %v242_v6 = vadd.f32 %v274_v61, %v233_v4 }
 0x30a   :  { %v256_v7 = vmul.f32 %v253_v5, %v242_v6 }
 0x30c   :  { %258 = vst.msk [vmem:[%s433_s8 + $0x8] sm:$0xff] %vm56_vm1, %v256_v7 }

// kernel: encoder_forward.4
= control target key start
LH: loop header
LB: loop body
LE: loop exit
PB: predicated region body
PF: predicated region fallthrough
CT: control target
= control target key end

     0   :  { %s1650_s18 = smov 0   ;;  %s1866_s0 = inlined_call_operand.vmem [shape: f32[2,8,32], index: 0, kind: input, shape index: {}]   ;;  %s1867_s1 = inlined_call_operand.vmem [shape: f32[2,8,32], index: 1, kind: input, shape index: {}]   ;;  %s1868_s2 = inlined_call_operand.vmem [shape: f32[2,8,1], index: 2, kind: input, shape index: {}]   ;;  %s1869_s3 = inlined_call_operand.vmem [shape: bf16[32,64], index: 3, kind: input, shape index: {}]   ;;  %s1870_s4 = inlined_call_operand.vmem [shape: bf16[32,64], index: 4, kind: input, shape index: {}]   ;;  %s1871_s5 = inlined_call_operand.vmem [shape: f32[4,64], index: 5, kind: input, shape index: {}]   ;;  %s1872_s6 = inlined_call_operand.vmem [shape: f32[1,64], index: 6, kind: input, shape index: {}]   ;;  %s1873_s7 = inlined_call_operand.vmem [shape: bf16[64,2], index: 7, kind: input, shape index: {}]   ;;  %s1874_s8 = inlined_call_operand.vmem [shape: bf16[64,16], index: 8, kind: input, shape index: {}]   ;;  %s1875_s9 = inlined_call_operand.vmem [shape: bf16[64,16], index: 9, kind: input, shape index: {}]   ;;  %s1876_s10 = inlined_call_operand.vmem [shape: bf16[2,64], index: 10, kind: input, shape index: {}]   ;;  %s1877_s11 = inlined_call_operand.vmem [shape: f32[1,64], index: 11, kind: input, shape index: {}]   ;;  %s1878_s12 = inlined_call_operand.vmem [shape: f32[16,64], index: 12, kind: input, shape index: {}]   ;;  %s1879_s13 = inlined_call_operand.vmem [shape: f32[1,64], index: 13, kind: input, shape index: {}]   ;;  %s1880_s14 = inlined_call_operand.vmem [shape: bf16[64,32], index: 14, kind: input, shape index: {}]   ;;  %s1881_s15 = inlined_call_operand.vmem [shape: f32[2,8,32], index: 15, kind: output, shape index: {}]  }
   0x1 LB: > { %s1294_s19 = sadd.s32 4294967295, %s1549_s18   ;;  %p1298_p0 = scmp.ge.s32.totalorder %s1549_s18, 1  ;;  %s1549_s18 = sphi %s1650_s18, %s25_s18  }
   0x2   : > { %p454_p1 = scmp.lt.s32.totalorder %s1549_s18, 3 }
   0x4   : > { %p455_p2 = pnand %p1298_p0, %p454_p1 }
   0x5   : > { %v1490_v0 = vld [vmem:[%s1869_s3] sm:$0xff] (!%p455_p2)   ;;  %v1567_v1 = vmov (!%p455_p2), 0.0   ;;  %v1491_v2 = vld [vmem:[%s1869_s3 + $0x8] sm:$0xff] (!%p455_p2)   ;;  %vm1568_vm0 = vmmov (!%p455_p2), 0   ;;  %p508_p3 = scmp.lt.s32.totalorder (!%p455_p2), %s1294_s19, 1  ;;  %vm545_vm1 = vcmask (!%p455_p2), 261120   ;;  %v645_v8 = vlaneseq (!%p455_p2) }
   0x6   : > { %458 = sbr.rel (%p455_p2) target bundleno = 1165 (0x48d), region = 80  ;;  %1377 = vmatprep.subr.bf16.mxu0 (!%p455_p2), %v1567_v1  ;;  %1385 = vmatprep.subr.bf16.mxu1 (!%p455_p2), %v1567_v1  ;;  %v1492_v7 = vld [vmem:[%s1870_s4] sm:$0xff] (!%p455_p2)   ;;  %v1493_v9 = vld [vmem:[%s1870_s4 + $0x8] sm:$0xff] (!%p455_p2)   ;;  %v1498_v19 = vld [vmem:[%s1873_s7 + $0x10] sm:$0xff] (!%p455_p2)   ;;  %vm932_vm7 = vcmask (!%p455_p2), 1040384   ;;  %vm731_vm8 = vcmask (!%p455_p2), 523264  }
   0x7   : > { %1378 = vmatpush3.bf16.msra.mxu0 (!%p455_p2), %v1490_v0  ;;  %1381 = vmatprep.mubr.msk.bf16.mxu0 (!%p455_p2), %vm1568_vm0, %v1567_v1  ;;  %v1494_v10 = vld [vmem:[%s1873_s7] sm:$0xff] (!%p455_p2)   ;;  %v646_v11 = vshrl.u32 (!%p455_p2), %v645_v8, 7  ;;  %v995_v14 = vand.u32 (!%p455_p2), 127, %v645_v8  ;;  %v1496_v15 = vld [vmem:[%s1873_s7 + $0x8] sm:$0xff] (!%p455_p2)   ;;  %v1499_v20 = vld [vmem:[%s1874_s8 + $0x10] sm:$0xff] (!%p455_p2)   ;;  %vm988_vm9 = vcmask (!%p455_p2), 130048  }
   0x8   : > { %1379 = vmatprep.subr.bf16.mxu0 (!%p455_p2), %v1567_v1  ;;  %1389 = vmatprep.mubr.msk.bf16.mxu1 (!%p455_p2), %vm1568_vm0, %v1567_v1  ;;  %v1495_v12 = vld [vmem:[%s1874_s8] sm:$0xff] (!%p455_p2)   ;;  %v1497_v16 = vld [vmem:[%s1874_s8 + $0x8] sm:$0xff] (!%p455_p2)   ;;  %v1500_v21 = vld [vmem:[%s1873_s7 + $0x18] sm:$0xff] (!%p455_p2)   ;;  %vm928_vm10 = vcmask (!%p455_p2), 15360   ;;  %s1551_s26 = smov (!%p455_p2), 0  }
   0x9   : > { %1386 = vmatpush3.bf16.msra.mxu1 (!%p455_p2), %v1492_v7  ;;  %v993_v13 = vadd.s32 (!%p455_p2), 8, %v646_v11  ;;  %vm996_vm2 = vcmp.eq.s32.totalorder (!%p455_p2), %v646_v11, %v995_v14  ;;  %v1501_v22 = vld [vmem:[%s1874_s8 + $0x18] sm:$0xff] (!%p455_p2)   ;;  %v1309_v24 = vld [vmem:[%s1871_s5 + $0x3] ss:$0 sm:$0xff] (!%p455_p2)  ;;  %vm654_vm4 = vcmp.ge.s32.totalorder (!%p455_p2), %v646_v11, 3  ;;  %vm664_vm5 = vcmp.ge.s32.totalorder (!%p455_p2), %v646_v11, 2 }
   0xa   : > { %1387 = vmatprep.subr.bf16.mxu1 (!%p455_p2), %v1567_v1  ;;  %v1719_v17 = vsel (!%p455_p2), %vm996_vm2, 1.0, %v1567_v1  ;;  %v1310_v26 = vld [vmem:[%s1871_s5] ss:$0 sm:$0xff] (!%p455_p2)  ;;  %vm674_vm6 = vcmp.ge.s32.totalorder (!%p455_p2), %v646_v11, 1  ;;  %v1311_v33 = vld [vmem:[%s1871_s5 + $0x1] ss:$0 sm:$0xff] (!%p455_p2) }
   0xb   : > { %1380 = vmatpush3.bf16.msra.mxu0 (!%p455_p2), %v1491_v2  ;;  %vm997_vm3 = vcmp.eq.s32.totalorder (!%p455_p2), %v993_v13, %v995_v14  ;;  %v1312_v38 = vld [vmem:[%s1871_s5 + $0x2] ss:$0 sm:$0xff] (!%p455_p2)  ;;  %v1313_v43 = vld [vmem:[%s1872_s6] ss:$0 sm:$0xff] (!%p455_p2)  ;;  %v1503_v55 = vld [vmem:[%s1875_s9 + $0x8] sm:$0xff] (!%p455_p2)  }
   0xc   : > { %1393 = vmatprep.subr.bf16.mxu0 (!%p455_p2), %v1567_v1  ;;  %v1722_v18 = vsel (!%p455_p2), %vm997_vm3, 1.0, %v1567_v1  ;;  %v920_v51 = vld [vmem:[%s1876_s10] sm:$0x1] (!%p455_p2)  ;;  %v1504_v56 = vld [vmem:[%s1875_s9 + $0x10] sm:$0xff] (!%p455_p2)   ;;  %v1505_v57 = vld [vmem:[%s1875_s9 + $0x18] sm:$0xff] (!%p455_p2)  }
   0xd   : > { %s1883_s19 = smov (!%p508_p3, %s1294_s19), 1  ;;  %1388 = vmatpush3.bf16.msra.mxu1 %v1493_v9  ;;  %v1502_v52 = vld [vmem:[%s1875_s9] sm:$0xff]   ;;  %v934_v54 = vsel %vm932_vm7, %v920_v51, 0  ;;  %v992_v13 = vld [vmem:[%s1878_s12 + $0x8] sm:$0xff] }
   0xe   : > { %s1671_s24 = sshll.u32 %s1883_s19, 3  ;;  %1405 = vmatprep.subr.bf16.mxu1 %v1567_v1  ;;  %v1330_v14 = vld [vmem:[%s1877_s11] ss:$0 sm:$0xff] }
   0xf   : > { %s511_s27 = scalar_lea.vmem %s1866_s0, %s1671_s24  ;;  %s515_s30 = scalar_lea.vmem %s1867_s1, %s1671_s24 }
  0x10   : > { %s519_s20 = scalar_lea.vmem %s1868_s2, %s1671_s24  ;;  %s523_s22 = scalar_lea.vmem %s1881_s15, %s1671_s24  ;;  %v525_v3 = vld [vmem:[%s511_s27] sm:$0xff] }
  0x11   : > { %v526_v4 = vld [vmem:[%s515_s30] sm:$0xff] }
  0x12   : > { %v527_v5 = vadd.f32 %v526_v4, %v525_v3 }
  0x14   : > { %v528_v6 = vpack.c.bf16 %v527_v5, %v527_v5 }
  0x16   : > { %1382 = vmatmul.mubr.msk.bf16.vlgmr.msra.gmra.mrb[0].mxu0 %vm545_vm1, %v528_v6  ;;  %1390 = vmatmul.mubr.msk.bf16.vlgmr.msra.gmra.mrb[0].mxu1 %vm545_vm1, %v528_v6 }
  0x17   : > { %1401 = vmatprep.mubr.msk.bf16.mxu0 %vm1568_vm0, %v1567_v1  ;;  %1394 = vmatpush3.bf16.msra.mxu0 %v1494_v10 }
  0x18   : > { %1406 = vmatpush3.bf16.msra.mxu1 %v1495_v12  ;;  %1395 = vmatprep.subr.bf16.mxu0 %v1567_v1  ;;  %v991_v12 = vld [vmem:[%s1878_s12] sm:$0xff] }
  0x19   : > { %1407 = vmatprep.subr.bf16.mxu1 %v1567_v1  ;;  %1413 = vmatprep.mubr.msk.bf16.mxu1 %vm1568_vm0, %v1567_v1 }
  0x1b   : > { %1396 = vmatpush3.bf16.msra.mxu0 %v1496_v15 }
  0x1c   : > { %1408 = vmatpush3.bf16.msra.mxu1 %v1497_v16  ;;  %1397 = vmatprep.subr.bf16.mxu0 %v1567_v1 }
  0x1d   : > { %1409 = vmatprep.subr.bf16.mxu1 %v1567_v1 }
  0x1f   : > { %1398 = vmatpush3.bf16.msra.mxu0 %v1498_v19 }
  0x20   : > { %1410 = vmatpush3.bf16.msra.mxu1 %v1499_v20  ;;  %1399 = vmatprep.subr.bf16.mxu0 %v1567_v1 }
  0x21   : > { %1411 = vmatprep.subr.bf16.mxu1 %v1567_v1 }
  0x23   : > { %1400 = vmatpush3.bf16.msra.mxu0 %v1500_v21 }
  0x24   : > { %1412 = vmatpush3.bf16.msra.mxu1 %v1501_v22  ;;  %1417 = vmatprep.subr.bf16.mxu0 %v1567_v1 }
  0x25   : > { %1429 = vmatprep.subr.bf16.mxu1 %v1567_v1 }
  0xe9   : > { %v583_v23 = vpop.f32.mrb[0].mxu0  ;;  %v1786_v58 = vpop.f32.mrb[0].mxu1 }
  0xea   : > { %v653_v25 = vrot.slane %v583_v23, 5  ;;  %v663_v27 = vrot.slane %v583_v23, 6  ;;  %v673_v28 = vrot.slane %v583_v23, 7  ;;  %v1383_v29 = vpop.f32.mrb[1].mxu0  ;;  %v652_v35 = vmul.f32 %v1309_v24, %v583_v23  ;;  %v1391_v59 = vpop.f32.mrb[1].mxu1 }
  0xeb   : > { %v586_v30 = vpop.f32.mrb[2].mxu0  ;;  %v642_v60 = vpop.f32.mrb[2].mxu1 }
  0xec   : > { %v655_v31 = vsel %vm654_vm4, %v653_v25, 0.0  ;;  %v665_v32 = vsel %vm664_vm5, %v663_v27, 0.0  ;;  %v1384_v34 = vpop.f32.mrb[3].mxu0  ;;  %v675_v37 = vsel %vm674_vm6, %v673_v28, 0.0  ;;  %v1392_v61 = vpop.f32.mrb[3].mxu1 }
  0xed   : > { %v661_v36 = vmul.f32 %v1310_v26, %v655_v31  ;;  %v671_v40 = vmul.f32 %v1311_v33, %v665_v32  ;;  %v681_v42 = vmul.f32 %v1312_v38, %v675_v37 }
  0xef   : > { %v662_v39 = vadd.f32 %v661_v36, %v652_v35 }
  0xf1   : > { %v672_v41 = vadd.f32 %v671_v40, %v662_v39 }
  0xf3   : > { %v682_v44 = vadd.f32 %v681_v42, %v672_v41 }
  0xf5   : > { %v690_v45 = vadd.f32 %v1313_v43, %v682_v44 }
  0xf7   : > { %v1314_v46 = vmul.f32 -1.442695, %v690_v45 }
  0xf9   : > { %1506 = vpow2.f32 %v1314_v46 }
 0x103   : > { %v1507_v47 = vpop.eup %1506 }
 0x104   : > { %v694_v48 = vadd.f32 1.0, %v1507_v47 }
 0x106   : > { %1508 = vrcp.f32 %v694_v48 }
 0x110   : > { %v1509_v49 = vpop.eup %1508 }
 0x111   : > { %v1757_v50 = vmul.f32 %v1509_v49, %v690_v45 }
 0x113   : > { %v698_v53 = vpack.c.bf16 %v1757_v50, %v1757_v50 }
 0x115   : > { %1402 = vmatmul.mubr.msk.bf16.vlgmr.msra.gmra.mrb[4].mxu0 %vm731_vm8, %v698_v53  ;;  %1414 = vmatmul.mubr.msk.bf16.vlgmr.msra.gmra.mrb[4].mxu1 %vm731_vm8, %v698_v53 }
 0x116   : > { %1418 = vmatpush3.bf16.msra.mxu0 %v1502_v52  ;;  %1425 = vmatprep.mubr.msk.bf16.mxu0 %vm1568_vm0, %v1567_v1 }
 0x117   : > { %1419 = vmatprep.subr.bf16.mxu0 %v1567_v1  ;;  %1430 = vmatpush3.bf16.msra.mxu1 %v934_v54 }
 0x118   : > { %1431 = vmatprep.mubr.msk.bf16.mxu1 %vm1568_vm0, %v1567_v1 }
 0x11a   : > { %1420 = vmatpush3.bf16.msra.mxu0 %v1503_v55 }
 0x11b   : > { %1421 = vmatprep.subr.bf16.mxu0 %v1567_v1 }
 0x11e   : > { %1422 = vmatpush3.bf16.msra.mxu0 %v1504_v56 }
 0x11f   : > { %1423 = vmatprep.subr.bf16.mxu0 %v1567_v1 }
 0x122   : > { %1424 = vmatpush3.bf16.msra.mxu0 %v1505_v57 }
 0x125   : > { %1426 = vmatmul.mubr.msk.bf16.vlgmr.msra.gmra.mrb[8].mxu0 %vm731_vm8, %v698_v53 }
 0x1e8   : > { %v769_v62 = vpop.f32.mrb[4].mxu0  ;;  %v841_v63 = vpop.f32.mrb[4].mxu1 }
 0x1e9   : > { %v919_v0 = vpack.c.bf16 %v769_v62, %v769_v62  ;;  %989 = vst.msk [vmem:[#allocation4] sm:$0xff] %vm988_vm9, %v841_v63  ;;  %v1403_v2 = vpop.f32.mrb[5].mxu0  ;;  %v1415_v3 = vpop.f32.mrb[5].mxu1 }
 0x1ea   : > { %v772_v4 = vpop.f32.mrb[6].mxu0  ;;  %v844_v5 = vpop.f32.mrb[6].mxu1 }
 0x1eb   : > { %v1404_v6 = vpop.f32.mrb[7].mxu0  ;;  %v1416_v7 = vpop.f32.mrb[7].mxu1  ;;  %1432 = vmatmul.mubr.msk.bf16.vlgmr.msra.gmra.mrb[8].mxu1 %vm928_vm10, %v919_v0 }
 0x1f8   : > { %v913_v8 = vpop.f32.mrb[8].mxu0 }
 0x1f9   : > { %990 = vst.msk [vmem:[#allocation5] sm:$0xff] %vm988_vm9, %v913_v8  ;;  %v1427_v9 = vpop.f32.mrb[9].mxu0 }
 0x1fa   : > { %v916_v10 = vpop.f32.mrb[10].mxu0 }
 0x1fb   : > { %v1428_v11 = vpop.f32.mrb[11].mxu0 }
 0x2be   : > { %v970_v15 = vpop.f32.mrb[8].mxu1 }
 0x2bf   : > { %v971_v16 = vadd.f32 %v1330_v14, %v970_v15  ;;  %v1433_v19 = vpop.f32.mrb[9].mxu1 }
 0x2c0   : > { %v973_v20 = vpop.f32.mrb[10].mxu1 }
 0x2c1   : > { %v977_v21 = vand.u32 2147483647, %v971_v16  ;;  %v1434_v22 = vpop.f32.mrb[11].mxu1  ;;  %v976_v28 = vmax.f32 %v971_v16, 0.0 }
 0x2c3   : > { %v978_v23 = vsub.f32 0.0, %v977_v21 }
 0x2c5   : > { %v979_v24 = vmul.f32 1.442695, %v978_v23 }
 0x2c7   : > { %1510 = vpow2.f32 %v979_v24 }
 0x2d1   : > { %v1511_v25 = vpop.eup %1510 }
 0x2d2   : > { %v981_v26 = vadd.f32 1.0, %v1511_v25 }
 0x2d4   : > { %1512 = vlog2.f32 %v981_v26 }
 0x2de   : > { %v1513_v27 = vpop.eup %1512 }
 0x2df   : > { %v983_v29 = vmul.f32 0.6931472, %v1513_v27 }
 0x2e1   : > { %v984_v30 = vadd.f32 %v983_v29, %v976_v28 }
 0x2e3   : > { %985 = vst.msk [vmem:[#allocation2] sm:$0xff] %vm731_vm8, %v984_v30  ;;  %v986_v31 = vmul.f32 %v984_v30, %v1757_v50 }
 0x2e5   : > { %987 = vst.msk [vmem:[#allocation3] sm:$0xff] %vm731_vm8, %v986_v31 }
 0x2e6 LB: >> { %s1008_s28 = scalar_lea.vmem [#allocation2], %s1553_s26  ;;  %s1335_s27 = sshll.u32 %s1553_s26, 4  ;;  %s1553_s26 = sphi %s1551_s26, %s1007_s26  }
 0x2e7   : >> { %s1021_s29 = scalar_lea.vmem [#allocation7], %s1335_s27  ;;  %s1007_s26 = sadd.s32 1, %s1553_s26  }
 0x2e8   : >> { %p1004_p4 = scmp.ge.s32.totalorder %s1007_s26, 8  }
 0x2e9   : > { %v1555_v39 = vmov (%p1004_p4), 0.0   ;;  %v1559_v40 = vmov (%p1004_p4), 0.0   ;;  %s1804_s30 = smov (%p1004_p4), 0  }
 0x2ea   : >> { %v1334_v32 = vld [vmem:[%s1008_s28] ss:$0 sm:$0xff] }
 0x2eb   : >> { %v1014_v33 = vmul.f32 %v1334_v32, %v991_v12  ;;  %v1015_v34 = vmul.f32 %v1334_v32, %v992_v13 }
 0x2ed   : >> { %v1016_v35 = vmul.f32 1.442695, %v1014_v33  ;;  %v1018_v36 = vmul.f32 1.442695, %v1015_v34 }
 0x2ef   : >> { %1514 = vpow2.f32 %v1016_v35 }
 0x2f0   : >> { %1516 = vpow2.f32 %v1018_v36 }
 0x2f5   : > { %1006 = sbr.rel (!%p1004_p4) target bundleno = 742 (0x2e6), region = 137 }
 0x2f9   : >> { %v1515_v37 = vpop.eup %1514 }
 0x2fa   : >> { %v1517_v38 = vpop.eup %1516  ;;  %1022 = vst.msk [vmem:[%s1021_s29] sm:$0xff] %vm731_vm8, %v1515_v37 }
 0x2fb   : >> { %1023 = vst.msk [vmem:[%s1021_s29 + $0x8] sm:$0xff] %vm731_vm8, %v1517_v38 }
 0x2fc LB: >> { %s1034_s16 = scalar_lea.vmem [#allocation4], %s1565_s30  ;;  %s1036_s17 = scalar_lea.vmem [#allocation5], %s1565_s30  ;;  %vm1088_vm11 = vcmask 516096   ;;  %s1565_s30 = sphi %s1804_s30, %s1029_s30   ;;  %v1561_v40 = vphi %v1559_v40, %v1074_v40   ;;  %v1557_v39 = vphi %v1555_v39, %v1075_v39  }
 0x2fd   : >> { %v1336_v41 = vld [vmem:[%s1034_s16] ss:$0 sm:$0xff]  ;;  %s1338_s19 = sshll.u32 %s1565_s30, 4  ;;  %s1032_s23 = scalar_lea.vmem [#allocation3], %s1565_s30 }
 0x2fe   : >> { %v1042_v42 = vmul.f32 %v1336_v41, %v1719_v17  ;;  %v1337_v43 = vld [vmem:[%s1036_s17] ss:$0 sm:$0xff]  ;;  %v1043_v44 = vmul.f32 %v1336_v41, %v1722_v18  ;;  %s1063_s21 = scalar_lea.vmem [#allocation7], %s1338_s19  ;;  %s1087_s25 = scalar_lea.vmem [#allocation6], %s1565_s30 }
 0x2ff   : >> { %v1054_v45 = vmul.f32 %v1337_v43, %v1719_v17  ;;  %v1055_v46 = vmul.f32 %v1337_v43, %v1722_v18  ;;  %v1339_v53 = vld [vmem:[%s1032_s23] ss:$0 sm:$0xff]  ;;  %s1029_s30 = sadd.s32 1, %s1565_s30  }
 0x300   : >> { %v1044_v47 = vsel %vm988_vm9, %v1042_v42, 0.0  ;;  %v1047_v49 = vsel %vm988_vm9, %v1043_v44, 0.0  ;;  %p1026_p5 = scmp.ge.s32.totalorder %s1029_s30, 8  }
 0x301   : >> { %1045 = vadd.xlane.f32.xlu0 %v1044_v47  ;;  %v1056_v48 = vsel %vm988_vm9, %v1054_v45, 0.0  ;;  %v1059_v51 = vsel %vm988_vm9, %v1055_v46, 0.0  ;;  %1435 = vmatprep.subr.bf16.mxu1 (%p1026_p5), %v1567_v1  ;;  %v1519_v12 = vld [vmem:[%s1880_s14] sm:$0xff] (%p1026_p5)   ;;  %v1569_v13 = vmov (%p1026_p5), 0   ;;  %v1520_v14 = vld [vmem:[%s1880_s14 + $0x8] sm:$0xff] (%p1026_p5)   ;;  %v1521_v15 = vld [vmem:[%s1880_s14 + $0x10] sm:$0xff] (%p1026_p5)  }
 0x302   : >> { %1057 = vadd.xlane.f32.xlu1 %v1056_v48  ;;  %v1064_v52 = vld [vmem:[%s1063_s21] sm:$0xff]  ;;  %v1065_v56 = vld [vmem:[%s1063_s21 + $0x8] sm:$0xff]  ;;  %1443 = vmatprep.mubr.msk.bf16.mxu1 (%p1026_p5), %vm1568_vm0, %v1567_v1  ;;  %v1341_v17 = vmul.f32 (%p1026_p5), -1.442695, %v1786_v58  ;;  %v1522_v16 = vld [vmem:[%s1880_s14 + $0x18] sm:$0xff] (%p1026_p5)  }
 0x303   : >> { %v1066_v54 = vmul.f32 %v1561_v40, %v1064_v52  ;;  %v1067_v60 = vmul.f32 %v1557_v39, %v1065_v56  ;;  %1518 = vset.pattern.permute.xlu0 (%p1026_p5), %v1569_v13  ;;  %1436 = vmatpush3.bf16.msra.mxu1 (%p1026_p5), %v1519_v12  ;;  %v1184_v18 = vld [vmem:[%s519_s20] sm:$0xff] (%p1026_p5) }
 0x304   : > { %1437 = vmatprep.subr.bf16.mxu1 (%p1026_p5), %v1567_v1  ;;  %1523 = vpow2.f32 (%p1026_p5), %v1341_v17  ;;  %v1340_v21 = vld [vmem:[%s1879_s13] ss:$0 sm:$0xff] (%p1026_p5) }
 0x305   : >> { %1048 = vadd.xlane.f32.xlu0 %v1047_v49  ;;  %v1098_v22 = vmul.f32 (%p1026_p5), %v1340_v21, %v1757_v50 }
 0x306   : >> { %1060 = vadd.xlane.f32.xlu1 %v1059_v51 }
 0x307   : > { %1438 = vmatpush3.bf16.msra.mxu1 (%p1026_p5), %v1520_v14 }
 0x308   : > { %1439 = vmatprep.subr.bf16.mxu1 (%p1026_p5), %v1567_v1 }
 0x30b   : > { %1440 = vmatpush3.bf16.msra.mxu1 (%p1026_p5), %v1521_v15 }
 0x30c   : > { %1441 = vmatprep.subr.bf16.mxu1 (%p1026_p5), %v1567_v1 }
 0x30e   : > { %v1524_v19 = vpop.eup (%p1026_p5), %1523 }
 0x30f   : > { %1442 = vmatpush3.bf16.msra.mxu1 (%p1026_p5), %v1522_v16  ;;  %v1103_v20 = vadd.f32 (%p1026_p5), 1.0, %v1524_v19 }
 0x311   : > { %1525 = vrcp.f32 (%p1026_p5), %v1103_v20 }
 0x31b   : > { %1187 = vperm.xlu0 (%p1026_p5), %1518, %v1184_v18   ;;  %v1526_v25 = vpop.eup (%p1026_p5), %1525 }
 0x31c   : > { %v1106_v26 = vmul.f32 (%p1026_p5), %v1526_v25, %v1786_v58 }
 0x38e   : >> { %v1046_v55 = vpop.xlane.xlu0 %1045 }
 0x38f   : >> { %v1072_v57 = vmul.f32 %v1339_v53, %v1046_v55  ;;  %v1058_v59 = vpop.xlane.xlu1 %1057 }
 0x391   : >> { %v1074_v40 = vadd.f32 %v1072_v57, %v1066_v54  }
 0x392   : >> { %v1049_v61 = vpop.xlane.xlu0 %1048 }
 0x393   : >> { %v1073_v62 = vmul.f32 %v1339_v53, %v1049_v61  ;;  %v1061_v63 = vpop.xlane.xlu1 %1060  ;;  %v1076_v0 = vmul.f32 %v1074_v40, %v1058_v59 }
 0x395   : >> { %v1075_v39 = vadd.f32 %v1073_v62, %v1067_v60   ;;  %v1078_v3 = vsel %vm731_vm8, %v1076_v0, 0.0 }
 0x397   : >> { %v1077_v2 = vmul.f32 %v1075_v39, %v1061_v63 }
 0x399   : >> { %v1079_v4 = vsel %vm731_vm8, %v1077_v2, 0.0 }
 0x39a   : >> { %v1080_v5 = vadd.f32 %v1079_v4, %v1078_v3  ;;  %v1188_v1 = vpop.permute.xlu0 (%p1026_p5), %1187 }
 0x39c   : >> { %v1081_v6 = vrot.slane %v1080_v5, 4 }
 0x39e   : >> { %v1082_v7 = vadd.f32 %v1081_v6, %v1080_v5 }
 0x3a0   : >> { %v1083_v8 = vrot.slane %v1082_v7, 2 }
 0x3a2   : >> { %v1084_v9 = vadd.f32 %v1083_v8, %v1082_v7  ;;  %1028 = sbr.rel (!%p1026_p5) target bundleno = 764 (0x2fc), region = 148 }
 0x3a4   : >> { %v1085_v10 = vrot.slane %v1084_v9, 1 }
 0x3a6   : >> { %v1086_v11 = vadd.f32 %v1085_v10, %v1084_v9 }
 0x3a8   : >> { %1089 = vst.msk [vmem:[%s1087_s25] sm:$0x1] %vm1088_vm11, %v1086_v11 }
 0x3af   : > { %v1090_v23 = vld [vmem:[#allocation6] sm:$0xff] }
 0x3b0   : > { %v1099_v24 = vadd.f32 %v1098_v22, %v1090_v23 }
 0x3b2   : > { %v1107_v27 = vmul.f32 %v1106_v26, %v1099_v24 }
 0x3b4   : > { %v1108_v28 = vpack.c.bf16 %v1107_v27, %v1107_v27 }
 0x3b6   : > { %1444 = vmatmul.mubr.msk.bf16.vlgmr.msra.gmra.mrb[12].mxu1 %vm731_vm8, %v1108_v28 }
 0x489   : > { %v1178_v29 = vpop.f32.mrb[12].mxu1 }
 0x48a   : > { %v1190_v30 = vmul.f32 %v1188_v1, %v1178_v29  ;;  %v1445_v31 = vpop.f32.mrb[13].mxu1 }
 0x48b   : > { %v1181_v32 = vpop.f32.mrb[14].mxu1 }
 0x48c   : > { %1191 = vst.msk [vmem:[%s523_s22] sm:$0xff] %vm545_vm1, %v1190_v30  ;;  %v1446_v50 = vpop.f32.mrb[15].mxu1 }
 0x48d PF: > { %s25_s18 = sadd.s32 1, %s1549_s18  }
 0x48e   : > { %p22_p6 = scmp.ge.s32.totalorder %s25_s18, 4  }
 0x490   :  { %24 = sbr.rel (!%p22_p6) target bundleno = 1 (0x1), region = 159 }

</bundles_post_ra>
